<compile_context>
chip_gen: v7x
topology: tpu7x:2x2x1
jax: 0.10.0
libtpu: 0.0.40
codegen_flags: <defaults>
</compile_context>

<pallas_src>
from functools import partial

import numpy as np
import jax
import jax.numpy as jnp
from jax import lax
from jax.experimental import pallas as pl
from jax.experimental.pallas import tpu as pltpu


def _decoder_kernel(
    # inputs (whole-array VMEM blocks, no grid)
    enc_proj_ref, enc_cc_ref, conf_ref, gloc_ref, enc_idx_ref, enc_len_ref,
    neg_mask_ref, h0_ref,
    w_tok_ref, w_hh_ref, b_lstm_ref, w_hproj_ref, v_ref, bc_ref,
    w_head_ref, b_head_ref,
    # outputs
    vocab_out_ref, gate_out_ref, pred_out_ref,
    *, B, S, H, V, L, T, SOS):
  f32 = jnp.float32
  bf16 = jnp.bfloat16

  # ---- loop-invariant iotas and loads (hoisted out of the decode loop) ------
  iota_v = lax.broadcasted_iota(jnp.int32, (B, V), 1)
  iota_s = lax.broadcasted_iota(jnp.int32, (B, S), 1)
  iota_l = lax.broadcasted_iota(jnp.int32, (B, L), 1)

  enc_proj = enc_proj_ref[...]          # (B,S,H) f32 : enc @ W1_enc + b1   (hoisted)
  enc_cc = enc_cc_ref[...]              # (B,S,H) bf16: enc @ Wc_ctx        (hoisted)
  neg_mask = neg_mask_ref[...]          # (1,S)  f32  : 0 / -inf additive length mask
  enc_idx = enc_idx_ref[...]            # (B,S)  int32
  enc_len = enc_len_ref[...]            # (B,1)  int32
  w_tok = w_tok_ref[...]                # (V,4H) bf16 : embed folded into LSTM W_ih
  w_hh = w_hh_ref[...]                  # (H,4H) bf16
  b_lstm = b_lstm_ref[...]              # (1,4H) f32  : b_ih + b_hh
  w_hproj = w_hproj_ref[...]            # (H,2H) bf16 : [W1_dec ; Wc_dec] fused h-projection
  v_row = v_ref[...]                    # (1,H)  f32
  bc = bc_ref[...]                      # (1,H)  f32
  w_head = w_head_ref[...]              # (H,V+L) bf16: [U ; gate_Cj] fused head
  b_head = b_head_ref[...]              # (1,V+L) f32 : [u_b ; g_b]

  def step(t, carry):
    h_prev, prev_tok = carry            # (B,H) f32 decoder hidden, (B,1) int32 token id

    # ---- 1+2. embedding (folded into W_ih) + LSTM cell; (h, h) fed as (h0, c0) ----
    onehot = (iota_v == prev_tok).astype(bf16)                               # (B,V)
    gates = (jnp.dot(onehot, w_tok, preferred_element_type=f32)
             + jnp.dot(h_prev.astype(bf16), w_hh, preferred_element_type=f32)
             + b_lstm)                                                       # (B,4H)
    i_g = jax.nn.sigmoid(gates[:, 0:H])
    f_g = jax.nn.sigmoid(gates[:, H:2 * H])
    g_g = jnp.tanh(gates[:, 2 * H:3 * H])
    o_g = jax.nn.sigmoid(gates[:, 3 * H:4 * H])
    c_new = f_g * h_prev + i_g * g_g           # c_prev == h_prev (PyTorch quirk)
    h_new = o_g * jnp.tanh(c_new)              # (B,H) new decoder hidden
    h_bf = h_new.astype(bf16)

    # ---- 3. attention (encoder projection precomputed in wrapper) -----------
    hproj = jnp.dot(h_bf, w_hproj, preferred_element_type=f32)               # (B,2H)
    dec_part = hproj[:, :H]                                                  # W1 dec-half
    cj_hpart = hproj[:, H:]                                                  # concat dec-half

    energy = jnp.tanh(enc_proj + dec_part[:, None, :])                       # (B,S,H)
    e = jnp.sum(energy * v_row[None, :, :], axis=-1) + neg_mask              # (B,S)
    e_max = jnp.max(e, axis=-1, keepdims=True)
    p = jnp.exp(e - e_max)
    a = p * pl.reciprocal(jnp.sum(p, axis=-1, keepdims=True), approx=True)   # (B,S)
    # context @ Wc_ctx, as one MXU contraction against the hoisted enc @ Wc_ctx
    ctx_cc = jnp.einsum("bqs,bsh->bqh", a[:, None, :].astype(bf16), enc_cc,
                        preferred_element_type=f32)[:, 0, :]                 # (B,H)
    cj = jnp.tanh(cj_hpart + ctx_cc + bc)                                    # (B,H)

    # ---- 4+5. fused vocab / gate head ---------------------------------------
    heads = jnp.dot(cj.astype(bf16), w_head, preferred_element_type=f32) + b_head  # (B,V+L)

    logits = heads[:, :V]
    lmax = jnp.max(logits, axis=-1, keepdims=True)
    shifted = logits - lmax
    logsm = shifted - jnp.log(jnp.sum(jnp.exp(shifted), axis=-1, keepdims=True))
    M = conf_ref[t]                                                          # (B,V) conf row of enc word @ t
    p_vocab = logsm * M
    pv_max = jnp.max(p_vocab, axis=-1, keepdims=True)
    topvi = jnp.min(jnp.where(p_vocab == pv_max, iota_v, V), axis=-1, keepdims=True)  # (B,1)

    plogits = heads[:, V:] + gloc_ref[t]                  # gate row for the Loc one-hot at step t
    pmax = jnp.max(plogits, axis=-1, keepdims=True)
    pe = jnp.exp(plogits - pmax)
    pointer_dis = pe / jnp.sum(pe, axis=-1, keepdims=True)                   # (B,L) exact (returned)
    pd_max = jnp.max(pointer_dis, axis=-1, keepdims=True)
    toppi = jnp.min(jnp.where(pointer_dis == pd_max, iota_l, L), axis=-1, keepdims=True)  # (B,1)

    # ---- 6. next decoder input ----------------------------------------------
    pointed = jnp.sum(jnp.where(iota_s == toppi, enc_idx, 0), axis=-1, keepdims=True)   # (B,1)
    next_tok = jnp.where(toppi < enc_len - 1, pointed, topvi).astype(jnp.int32)         # (B,1)

    # ---- 7. per-step outputs (into full (T, B, .) VMEM blocks) ---------------
    vocab_out_ref[t] = p_vocab
    gate_out_ref[t] = pointer_dis
    pred_out_ref[t] = next_tok

    # ---- 8. carry state -------------------------------------------------------
    return h_new, next_tok

  h0 = h0_ref[...]
  tok0 = jnp.full((B, 1), SOS, jnp.int32)
  lax.fori_loop(0, T, step, (h0, tok0))


def init_params(key, V, E, H, L):
  ks = jax.random.split(key, 16)

  def rnd(k, shape, scale=0.1):
    return jax.random.normal(k, shape, jnp.float32) * scale

  embed = rnd(ks[0], (V, E), 0.5)                       # shared encoder embedding
  w_ih = rnd(ks[1], (4 * H, E))                          # nn.LSTM weight_ih_l0
  w_hh = rnd(ks[2], (4 * H, H))                          # nn.LSTM weight_hh_l0
  b_ih = rnd(ks[3], (1, 4 * H))
  b_hh = rnd(ks[4], (1, 4 * H))
  w1 = rnd(ks[5], (H, 2 * H))                            # W1 = Linear(2H, H), cat order [h_dec, enc]
  b1 = rnd(ks[6], (1, H))
  v = rnd(ks[7], (1, H), 1.0 / np.sqrt(H))               # attention vector v
  wc = rnd(ks[8], (H, 2 * H))                            # concat = Linear(2H, H), cat order [h_dec, ctx]
  bc = rnd(ks[9], (1, H))
  u_w = rnd(ks[10], (V, H))                              # U = Linear(H, V)
  u_b = rnd(ks[11], (1, V))
  g_w = rnd(ks[12], (L, H + L))                          # gate = Linear(H + L, L)
  g_b = rnd(ks[13], (1, L))
  # deterministic stand-in for the confusionset: row w = multi-hot confusion words of w,
  # rows with w % 3 == 0 are all-zero ("word not in confusionset").
  conf = jax.random.bernoulli(ks[14], 0.15, (V, V)).astype(jnp.float32)
  conf = conf * (jnp.arange(V)[:, None] % 3 != 0).astype(jnp.float32)

  return dict(
      embed=embed, conf=conf,
      w_ih_t=w_ih.T, w_hh_t=w_hh.T, b_ih=b_ih, b_hh=b_hh,
      w1h_t=w1[:, :H].T, w1e_t=w1[:, H:].T, b1=b1, v=v,
      wch_t=wc[:, :H].T, wcc_t=wc[:, H:].T, bc=bc,
      u_t=u_w.T, u_b=u_b,
      gcj_t=g_w[:, :H].T, gloc_t=g_w[:, H:].T, g_b=g_b)


def attn_decoder_forward(params, encoder_outputs, encoder_hidden,
                         encoder_seqs_index, encoder_seqs_len, *, sos_token=1):
  """encoder_outputs: (S, B, H)   encoder_hidden: (1, B, H)
     encoder_seqs_index: (B, S) int32   encoder_seqs_len: python list of ints."""
  S, B, H = encoder_outputs.shape
  V = params["u_t"].shape[-1]
  L = params["g_b"].shape[-1]
  max_len = max(encoder_seqs_len)
  T = max_len - 1                                   # max_decoder_len

  f32, bf16 = jnp.float32, jnp.bfloat16

  # layout: kernel consumes batch-major (B, S, H) encoder outputs.
  enc = jnp.transpose(encoder_outputs, (1, 0, 2)).astype(f32)          # (B,S,H)
  h0 = encoder_hidden[0].astype(f32)                                   # (B,H)

  # ---- step-invariant hoists & weight fusions (done once, outside the kernel) ----
  enc_proj = jnp.einsum("bsh,hk->bsk", enc, params["w1e_t"]) + params["b1"]   # (B,S,H) f32
  enc_cc = jnp.einsum("bsh,hk->bsk", enc, params["wcc_t"]).astype(bf16)       # (B,S,H) bf16
  w_tok = (params["embed"] @ params["w_ih_t"]).astype(bf16)                   # (V,4H): embed ∘ W_ih
  w_hh = params["w_hh_t"].astype(bf16)                                        # (H,4H)
  b_lstm = params["b_ih"] + params["b_hh"]                                    # (1,4H)
  # fused per-step h_new projection: [attention W1 dec-half ; concat Wc dec-half]
  w_hproj = jnp.concatenate([params["w1h_t"], params["wch_t"]], axis=1).astype(bf16)  # (H,2H)
  w_head = jnp.concatenate([params["u_t"], params["gcj_t"]], axis=1).astype(bf16)     # (H,V+L)
  b_head = jnp.concatenate([params["u_b"], params["g_b"]], axis=1)                    # (1,V+L)
  gloc3 = params["gloc_t"][:T].reshape(T, 1, L)                               # (T,1,L) f32
  # confusion rows of the encoder word at each decode step (only the T used rows)
  conf_tbv = jnp.transpose(params["conf"][encoder_seqs_index[:, :T]], (1, 0, 2))  # (T,B,V) f32
  v_row = params["v"]
  bc = params["bc"]

  # replicate the (whole-batch) length masking of the torch loop, as an additive mask
  mask = np.zeros((1, S), np.float32)
  for l in encoder_seqs_len:
    if l < max_len:
      mask[0, l:] = -np.inf
  neg_mask = jnp.asarray(mask)
  enc_len = jnp.asarray(np.asarray(encoder_seqs_len, np.int32).reshape(B, 1))
  enc_idx = encoder_seqs_index.astype(jnp.int32)

  kernel = partial(_decoder_kernel, B=B, S=S, H=H, V=V, L=L, T=T, SOS=sos_token)

  out_shape = (jax.ShapeDtypeStruct((T, B, V), jnp.float32),
               jax.ShapeDtypeStruct((T, B, L), jnp.float32),
               jax.ShapeDtypeStruct((T, B, 1), jnp.int32))

  # Single invocation (no grid): every operand is a whole-array VMEM block and the
  # decoder time loop lives inside the kernel.
  vlog, glog, pred = pl.pallas_call(
      kernel,
      out_shape=out_shape,
      compiler_params=pltpu.CompilerParams(vmem_limit_bytes=32 * 1024 * 1024),
  )(enc_proj, enc_cc, conf_tbv, gloc3, enc_idx, enc_len, neg_mask, h0,
    w_tok, w_hh, b_lstm, w_hproj, v_row, bc, w_head, b_head)

  all_vocab_logits = jnp.transpose(vlog, (1, 0, 2))        # (B, T, V)
  all_gate_logits = jnp.transpose(glog, (1, 0, 2))         # (B, T, L)
  all_predict_ids = jnp.transpose(pred[..., 0], (1, 0))    # (B, T) token ids (stand-in for words)
  return all_vocab_logits, all_gate_logits, all_predict_ids


if __name__ == "__main__":
  B, S, H, E, V, L = 8, 16, 32, 32, 64, 16
  SOS = 1

  key = jax.random.PRNGKey(0)
  kp, k1, k2, k3 = jax.random.split(key, 4)
  params = init_params(kp, V, E, H, L)

  encoder_outputs = jax.random.normal(k1, (S, B, H), jnp.float32)    # (seq, batch, hidden)
  encoder_hidden = jax.random.normal(k2, (1, B, H), jnp.float32)
  encoder_seqs_index = jax.random.randint(k3, (B, S), 0, V, dtype=jnp.int32)
  encoder_seqs_len = [16, 14, 16, 12, 16, 16, 10, 16]

  vlog, glog, preds = attn_decoder_forward(
      params, encoder_outputs, encoder_hidden, encoder_seqs_index,
      encoder_seqs_len, sos_token=SOS)
  jax.block_until_ready((vlog, glog, preds))

  T = max(encoder_seqs_len) - 1
  assert vlog.shape == (B, T, V)
  assert glog.shape == (B, T, L)
  assert preds.shape == (B, T)
  assert bool(jnp.all(jnp.isfinite(vlog)))
  assert bool(jnp.all(jnp.isfinite(glog)))
  assert bool(jnp.all((preds >= 0) & (preds < V)))
  print("KERNEL_OK")
</pallas_src>

<mosaic_0001>
module attributes {stable_mosaic.version = 11 : i64} {
  func.func @_decoder_kernel(%arg0: memref<8x16x32xf32, #tpu.memory_space<vmem>>, %arg1: memref<8x16x32xbf16, #tpu.memory_space<vmem>>, %arg2: memref<15x8x64xf32, #tpu.memory_space<vmem>>, %arg3: memref<15x1x16xf32, #tpu.memory_space<vmem>>, %arg4: memref<8x16xi32, #tpu.memory_space<vmem>>, %arg5: memref<8x1xi32, #tpu.memory_space<vmem>>, %arg6: memref<1x16xf32, #tpu.memory_space<vmem>>, %arg7: memref<8x32xf32, #tpu.memory_space<vmem>>, %arg8: memref<64x128xbf16, #tpu.memory_space<vmem>>, %arg9: memref<32x128xbf16, #tpu.memory_space<vmem>>, %arg10: memref<1x128xf32, #tpu.memory_space<vmem>>, %arg11: memref<32x64xbf16, #tpu.memory_space<vmem>>, %arg12: memref<1x32xf32, #tpu.memory_space<vmem>>, %arg13: memref<1x32xf32, #tpu.memory_space<vmem>>, %arg14: memref<32x80xbf16, #tpu.memory_space<vmem>>, %arg15: memref<1x80xf32, #tpu.memory_space<vmem>>, %arg16: memref<15x8x64xf32, #tpu.memory_space<vmem>>, %arg17: memref<15x8x16xf32, #tpu.memory_space<vmem>>, %arg18: memref<15x8x1xi32, #tpu.memory_space<vmem>>) attributes {dimension_semantics = [], scalar_prefetch = 0 : i64, scratch_operands = 0 : i64, tpu.core_type = #tpu.core_type<tc>} {
    %0 = tpu.iota {dimensions = array<i32: 1>} : vector<8x64xi32>
    %1 = tpu.iota {dimensions = array<i32: 1>} : vector<8x16xi32>
    %2 = tpu.iota {dimensions = array<i32: 1>} : vector<8x16xi32>
    %c0 = arith.constant 0 : index
    %c0_0 = arith.constant 0 : index
    %c0_1 = arith.constant 0 : index
    %3 = vector.load %arg0[%c0, %c0_0, %c0_1] : memref<8x16x32xf32, #tpu.memory_space<vmem>>, vector<8x16x32xf32>
    %c0_2 = arith.constant 0 : index
    %c0_3 = arith.constant 0 : index
    %c0_4 = arith.constant 0 : index
    %4 = vector.load %arg1[%c0_2, %c0_3, %c0_4] : memref<8x16x32xbf16, #tpu.memory_space<vmem>>, vector<8x16x32xbf16>
    %c0_5 = arith.constant 0 : index
    %c0_6 = arith.constant 0 : index
    %5 = vector.load %arg6[%c0_5, %c0_6] : memref<1x16xf32, #tpu.memory_space<vmem>>, vector<1x16xf32>
    %c0_7 = arith.constant 0 : index
    %c0_8 = arith.constant 0 : index
    %6 = vector.load %arg4[%c0_7, %c0_8] : memref<8x16xi32, #tpu.memory_space<vmem>>, vector<8x16xi32>
    %c0_9 = arith.constant 0 : index
    %c0_10 = arith.constant 0 : index
    %7 = vector.load %arg5[%c0_9, %c0_10] : memref<8x1xi32, #tpu.memory_space<vmem>>, vector<8x1xi32>
    %c0_11 = arith.constant 0 : index
    %c0_12 = arith.constant 0 : index
    %8 = vector.load %arg8[%c0_11, %c0_12] : memref<64x128xbf16, #tpu.memory_space<vmem>>, vector<64x128xbf16>
    %c0_13 = arith.constant 0 : index
    %c0_14 = arith.constant 0 : index
    %9 = vector.load %arg9[%c0_13, %c0_14] : memref<32x128xbf16, #tpu.memory_space<vmem>>, vector<32x128xbf16>
    %c0_15 = arith.constant 0 : index
    %c0_16 = arith.constant 0 : index
    %10 = vector.load %arg10[%c0_15, %c0_16] : memref<1x128xf32, #tpu.memory_space<vmem>>, vector<1x128xf32>
    %c0_17 = arith.constant 0 : index
    %c0_18 = arith.constant 0 : index
    %11 = vector.load %arg11[%c0_17, %c0_18] : memref<32x64xbf16, #tpu.memory_space<vmem>>, vector<32x64xbf16>
    %c0_19 = arith.constant 0 : index
    %c0_20 = arith.constant 0 : index
    %12 = vector.load %arg12[%c0_19, %c0_20] : memref<1x32xf32, #tpu.memory_space<vmem>>, vector<1x32xf32>
    %c0_21 = arith.constant 0 : index
    %c0_22 = arith.constant 0 : index
    %13 = vector.load %arg13[%c0_21, %c0_22] : memref<1x32xf32, #tpu.memory_space<vmem>>, vector<1x32xf32>
    %c0_23 = arith.constant 0 : index
    %c0_24 = arith.constant 0 : index
    %14 = vector.load %arg14[%c0_23, %c0_24] : memref<32x80xbf16, #tpu.memory_space<vmem>>, vector<32x80xbf16>
    %c0_25 = arith.constant 0 : index
    %c0_26 = arith.constant 0 : index
    %15 = vector.load %arg15[%c0_25, %c0_26] : memref<1x80xf32, #tpu.memory_space<vmem>>, vector<1x80xf32>
    %c0_27 = arith.constant 0 : index
    %c0_28 = arith.constant 0 : index
    %16 = vector.load %arg7[%c0_27, %c0_28] : memref<8x32xf32, #tpu.memory_space<vmem>>, vector<8x32xf32>
    %c1_i32 = arith.constant 1 : i32
    %17 = vector.broadcast %c1_i32 : i32 to vector<8x1xi32>
    %c0_i32 = arith.constant 0 : i32
    %c15_i32 = arith.constant 15 : i32
    %18 = arith.addi %c0_i32, %c15_i32 : i32
    %c1_i32_29 = arith.constant 1 : i32
    %19:2 = scf.for %arg19 = %c0_i32 to %18 step %c1_i32_29 iter_args(%arg20 = %16, %arg21 = %17) -> (vector<8x32xf32>, vector<8x1xi32>)  : i32 {
      %20 = vector.broadcast %arg21 : vector<8x1xi32> to vector<8x64xi32>
      %21 = arith.cmpi eq, %0, %20 : vector<8x64xi32>
      %22 = arith.extui %21 : vector<8x64xi1> to vector<8x64xi32>
      %23 = arith.sitofp %22 : vector<8x64xi32> to vector<8x64xf32>
      %24 = arith.truncf %23 : vector<8x64xf32> to vector<8x64xbf16>
      %cst = arith.constant dense<0.000000e+00> : vector<8x128xf32>
      %25 = tpu.matmul %24, %8, %cst {dimension_numbers = #tpu.dot_dimension_numbers<[1], [0], [0], [1], [0, 0, 1, 1], [], []>} : vector<8x64xbf16>, vector<64x128xbf16>, vector<8x128xf32> -> vector<8x128xf32>
      %26 = arith.truncf %arg20 : vector<8x32xf32> to vector<8x32xbf16>
      %cst_31 = arith.constant dense<0.000000e+00> : vector<8x128xf32>
      %27 = tpu.matmul %26, %9, %cst_31 {dimension_numbers = #tpu.dot_dimension_numbers<[1], [0], [0], [1], [0, 0, 1, 1], [], []>} : vector<8x32xbf16>, vector<32x128xbf16>, vector<8x128xf32> -> vector<8x128xf32>
      %28 = arith.addf %25, %27 : vector<8x128xf32>
      %29 = vector.broadcast %10 : vector<1x128xf32> to vector<8x128xf32>
      %30 = arith.addf %28, %29 : vector<8x128xf32>
      %31 = vector.extract_strided_slice %30 {offsets = [0, 0], sizes = [8, 32], strides = [1, 1]} : vector<8x128xf32> to vector<8x32xf32>
      %32 = arith.negf %31 : vector<8x32xf32>
      %33 = math.exp %32 : vector<8x32xf32>
      %cst_32 = arith.constant 1.000000e+00 : f32
      %34 = vector.broadcast %cst_32 : f32 to vector<8x32xf32>
      %35 = arith.addf %34, %33 : vector<8x32xf32>
      %36 = arith.divf %34, %35 : vector<8x32xf32>
      %37 = vector.extract_strided_slice %30 {offsets = [0, 32], sizes = [8, 32], strides = [1, 1]} : vector<8x128xf32> to vector<8x32xf32>
      %38 = arith.negf %37 : vector<8x32xf32>
      %39 = math.exp %38 : vector<8x32xf32>
      %cst_33 = arith.constant 1.000000e+00 : f32
      %40 = vector.broadcast %cst_33 : f32 to vector<8x32xf32>
      %41 = arith.addf %40, %39 : vector<8x32xf32>
      %42 = arith.divf %40, %41 : vector<8x32xf32>
      %43 = vector.extract_strided_slice %30 {offsets = [0, 64], sizes = [8, 32], strides = [1, 1]} : vector<8x128xf32> to vector<8x32xf32>
      %44 = math.tanh %43 : vector<8x32xf32>
      %45 = vector.extract_strided_slice %30 {offsets = [0, 96], sizes = [8, 32], strides = [1, 1]} : vector<8x128xf32> to vector<8x32xf32>
      %46 = arith.negf %45 : vector<8x32xf32>
      %47 = math.exp %46 : vector<8x32xf32>
      %cst_34 = arith.constant 1.000000e+00 : f32
      %48 = vector.broadcast %cst_34 : f32 to vector<8x32xf32>
      %49 = arith.addf %48, %47 : vector<8x32xf32>
      %50 = arith.divf %48, %49 : vector<8x32xf32>
      %51 = arith.mulf %42, %arg20 : vector<8x32xf32>
      %52 = arith.mulf %36, %44 : vector<8x32xf32>
      %53 = arith.addf %51, %52 : vector<8x32xf32>
      %54 = math.tanh %53 : vector<8x32xf32>
      %55 = arith.mulf %50, %54 : vector<8x32xf32>
      %56 = arith.truncf %55 : vector<8x32xf32> to vector<8x32xbf16>
      %cst_35 = arith.constant dense<0.000000e+00> : vector<8x64xf32>
      %57 = tpu.matmul %56, %11, %cst_35 {dimension_numbers = #tpu.dot_dimension_numbers<[1], [0], [0], [1], [0, 0, 1, 1], [], []>} : vector<8x32xbf16>, vector<32x64xbf16>, vector<8x64xf32> -> vector<8x64xf32>
      %58 = vector.extract_strided_slice %57 {offsets = [0, 0], sizes = [8, 32], strides = [1, 1]} : vector<8x64xf32> to vector<8x32xf32>
      %59 = vector.extract_strided_slice %57 {offsets = [0, 32], sizes = [8, 32], strides = [1, 1]} : vector<8x64xf32> to vector<8x32xf32>
      %60 = vector.shape_cast %58 : vector<8x32xf32> to vector<8x1x32xf32>
      %61 = vector.broadcast %60 : vector<8x1x32xf32> to vector<8x16x32xf32>
      %62 = arith.addf %3, %61 : vector<8x16x32xf32>
      %63 = math.tanh %62 : vector<8x16x32xf32>
      %64 = vector.shape_cast %12 : vector<1x32xf32> to vector<1x1x32xf32>
      %65 = vector.broadcast %64 : vector<1x1x32xf32> to vector<8x16x32xf32>
      %66 = arith.mulf %63, %65 : vector<8x16x32xf32>
      %cst_36 = arith.constant dense<0.000000e+00> : vector<8x16xf32>
      %67 = vector.multi_reduction <add>, %66, %cst_36 [2] : vector<8x16x32xf32> to vector<8x16xf32>
      %68 = vector.broadcast %5 : vector<1x16xf32> to vector<8x16xf32>
      %69 = arith.addf %67, %68 : vector<8x16xf32>
      %cst_37 = arith.constant dense<0xFF800000> : vector<8xf32>
      %70 = vector.multi_reduction <maximumf>, %69, %cst_37 [1] : vector<8x16xf32> to vector<8xf32>
      %71 = vector.shape_cast %70 : vector<8xf32> to vector<8x1xf32>
      %72 = vector.broadcast %71 : vector<8x1xf32> to vector<8x16xf32>
      %73 = arith.subf %69, %72 : vector<8x16xf32>
      %74 = math.exp %73 : vector<8x16xf32>
      %cst_38 = arith.constant dense<0.000000e+00> : vector<8xf32>
      %75 = vector.multi_reduction <add>, %74, %cst_38 [1] : vector<8x16xf32> to vector<8xf32>
      %76 = vector.shape_cast %75 : vector<8xf32> to vector<8x1xf32>
      %77 = tpu.reciprocal %76 {approx = true} : vector<8x1xf32> -> vector<8x1xf32>
      %78 = vector.broadcast %77 : vector<8x1xf32> to vector<8x16xf32>
      %79 = arith.mulf %74, %78 : vector<8x16xf32>
      %80 = vector.shape_cast %79 : vector<8x16xf32> to vector<8x1x16xf32>
      %81 = arith.truncf %80 : vector<8x1x16xf32> to vector<8x1x16xbf16>
      "tpu.trace_start"() <{level = 10 : i32, message = "bqs,bsh->bqh"}> : () -> ()
      %cst_39 = arith.constant dense<0.000000e+00> : vector<8x1x32xf32>
      %82 = tpu.matmul %81, %4, %cst_39 {dimension_numbers = #tpu.dot_dimension_numbers<[2], [1], [1], [2], [0, 0, 0, 1, 1, 2], [0], [0]>} : vector<8x1x16xbf16>, vector<8x16x32xbf16>, vector<8x1x32xf32> -> vector<8x1x32xf32>
      "tpu.trace_stop"() : () -> ()
      %83 = vector.shape_cast %82 : vector<8x1x32xf32> to vector<8x32xf32>
      %84 = arith.addf %59, %83 : vector<8x32xf32>
      %85 = vector.broadcast %13 : vector<1x32xf32> to vector<8x32xf32>
      %86 = arith.addf %84, %85 : vector<8x32xf32>
      %87 = math.tanh %86 : vector<8x32xf32>
      %88 = arith.truncf %87 : vector<8x32xf32> to vector<8x32xbf16>
      %cst_40 = arith.constant dense<0.000000e+00> : vector<8x80xf32>
      %89 = tpu.matmul %88, %14, %cst_40 {dimension_numbers = #tpu.dot_dimension_numbers<[1], [0], [0], [1], [0, 0, 1, 1], [], []>} : vector<8x32xbf16>, vector<32x80xbf16>, vector<8x80xf32> -> vector<8x80xf32>
      %90 = vector.broadcast %15 : vector<1x80xf32> to vector<8x80xf32>
      %91 = arith.addf %89, %90 : vector<8x80xf32>
      %92 = vector.extract_strided_slice %91 {offsets = [0, 0], sizes = [8, 64], strides = [1, 1]} : vector<8x80xf32> to vector<8x64xf32>
      %cst_41 = arith.constant dense<0xFF800000> : vector<8xf32>
      %93 = vector.multi_reduction <maximumf>, %92, %cst_41 [1] : vector<8x64xf32> to vector<8xf32>
      %94 = vector.shape_cast %93 : vector<8xf32> to vector<8x1xf32>
      %95 = vector.broadcast %94 : vector<8x1xf32> to vector<8x64xf32>
      %96 = arith.subf %92, %95 : vector<8x64xf32>
      %97 = math.exp %96 : vector<8x64xf32>
      %cst_42 = arith.constant dense<0.000000e+00> : vector<8xf32>
      %98 = vector.multi_reduction <add>, %97, %cst_42 [1] : vector<8x64xf32> to vector<8xf32>
      %99 = vector.shape_cast %98 : vector<8xf32> to vector<8x1xf32>
      %100 = math.log %99 : vector<8x1xf32>
      %101 = vector.broadcast %100 : vector<8x1xf32> to vector<8x64xf32>
      %102 = arith.subf %96, %101 : vector<8x64xf32>
      %103 = arith.index_cast %arg19 : i32 to index
      %c0_43 = arith.constant 0 : index
      %c0_44 = arith.constant 0 : index
      %104 = vector.load %arg2[%103, %c0_43, %c0_44] : memref<15x8x64xf32, #tpu.memory_space<vmem>>, vector<1x8x64xf32>
      %105 = vector.shape_cast %104 : vector<1x8x64xf32> to vector<8x64xf32>
      %106 = arith.mulf %102, %105 : vector<8x64xf32>
      %cst_45 = arith.constant dense<0xFF800000> : vector<8xf32>
      %107 = vector.multi_reduction <maximumf>, %106, %cst_45 [1] : vector<8x64xf32> to vector<8xf32>
      %108 = vector.shape_cast %107 : vector<8xf32> to vector<8x1xf32>
      %109 = vector.broadcast %108 : vector<8x1xf32> to vector<8x64xf32>
      %110 = arith.cmpf oeq, %106, %109 : vector<8x64xf32>
      %c64_i32 = arith.constant 64 : i32
      %111 = vector.broadcast %c64_i32 : i32 to vector<8x64xi32>
      %112 = arith.select %110, %0, %111 : vector<8x64xi1>, vector<8x64xi32>
      %cst_46 = arith.constant dense<2147483647> : vector<8xi32>
      %113 = vector.multi_reduction <minsi>, %112, %cst_46 [1] : vector<8x64xi32> to vector<8xi32>
      %114 = vector.shape_cast %113 : vector<8xi32> to vector<8x1xi32>
      %115 = vector.extract_strided_slice %91 {offsets = [0, 64], sizes = [8, 16], strides = [1, 1]} : vector<8x80xf32> to vector<8x16xf32>
      %116 = arith.index_cast %arg19 : i32 to index
      %c0_47 = arith.constant 0 : index
      %c0_48 = arith.constant 0 : index
      %117 = vector.load %arg3[%116, %c0_47, %c0_48] : memref<15x1x16xf32, #tpu.memory_space<vmem>>, vector<1x1x16xf32>
      %118 = vector.shape_cast %117 : vector<1x1x16xf32> to vector<1x16xf32>
      %119 = vector.broadcast %118 : vector<1x16xf32> to vector<8x16xf32>
      %120 = arith.addf %115, %119 : vector<8x16xf32>
      %cst_49 = arith.constant dense<0xFF800000> : vector<8xf32>
      %121 = vector.multi_reduction <maximumf>, %120, %cst_49 [1] : vector<8x16xf32> to vector<8xf32>
      %122 = vector.shape_cast %121 : vector<8xf32> to vector<8x1xf32>
      %123 = vector.broadcast %122 : vector<8x1xf32> to vector<8x16xf32>
      %124 = arith.subf %120, %123 : vector<8x16xf32>
      %125 = math.exp %124 : vector<8x16xf32>
      %cst_50 = arith.constant dense<0.000000e+00> : vector<8xf32>
      %126 = vector.multi_reduction <add>, %125, %cst_50 [1] : vector<8x16xf32> to vector<8xf32>
      %127 = vector.shape_cast %126 : vector<8xf32> to vector<8x1xf32>
      %128 = vector.broadcast %127 : vector<8x1xf32> to vector<8x16xf32>
      %129 = arith.divf %125, %128 : vector<8x16xf32>
      %cst_51 = arith.constant dense<0xFF800000> : vector<8xf32>
      %130 = vector.multi_reduction <maximumf>, %129, %cst_51 [1] : vector<8x16xf32> to vector<8xf32>
      %131 = vector.shape_cast %130 : vector<8xf32> to vector<8x1xf32>
      %132 = vector.broadcast %131 : vector<8x1xf32> to vector<8x16xf32>
      %133 = arith.cmpf oeq, %129, %132 : vector<8x16xf32>
      %c16_i32 = arith.constant 16 : i32
      %134 = vector.broadcast %c16_i32 : i32 to vector<8x16xi32>
      %135 = arith.select %133, %2, %134 : vector<8x16xi1>, vector<8x16xi32>
      %cst_52 = arith.constant dense<2147483647> : vector<8xi32>
      %136 = vector.multi_reduction <minsi>, %135, %cst_52 [1] : vector<8x16xi32> to vector<8xi32>
      %137 = vector.shape_cast %136 : vector<8xi32> to vector<8x1xi32>
      %138 = vector.broadcast %137 : vector<8x1xi32> to vector<8x16xi32>
      %139 = arith.cmpi eq, %1, %138 : vector<8x16xi32>
      %c0_i32_53 = arith.constant 0 : i32
      %140 = vector.broadcast %c0_i32_53 : i32 to vector<8x16xi32>
      %141 = arith.select %139, %6, %140 : vector<8x16xi1>, vector<8x16xi32>
      %cst_54 = arith.constant dense<0> : vector<8xi32>
      %142 = vector.multi_reduction <add>, %141, %cst_54 [1] : vector<8x16xi32> to vector<8xi32>
      %143 = vector.shape_cast %142 : vector<8xi32> to vector<8x1xi32>
      %c1_i32_55 = arith.constant 1 : i32
      %144 = vector.broadcast %c1_i32_55 : i32 to vector<8x1xi32>
      %145 = arith.subi %7, %144 : vector<8x1xi32>
      %146 = arith.cmpi slt, %137, %145 : vector<8x1xi32>
      %147 = arith.select %146, %143, %114 : vector<8x1xi1>, vector<8x1xi32>
      %148 = arith.index_cast %arg19 : i32 to index
      %c0_56 = arith.constant 0 : index
      %c0_57 = arith.constant 0 : index
      %149 = vector.load %arg16[%148, %c0_56, %c0_57] : memref<15x8x64xf32, #tpu.memory_space<vmem>>, vector<1x8x64xf32>
      %150 = vector.shape_cast %149 : vector<1x8x64xf32> to vector<8x64xf32>
      %151 = vector.shape_cast %106 : vector<8x64xf32> to vector<1x8x64xf32>
      tpu.vector_store %arg16[%148, %c0_56, %c0_57], %151 {strides = array<i32>} : memref<15x8x64xf32, #tpu.memory_space<vmem>>, vector<1x8x64xf32>,
      %152 = arith.index_cast %arg19 : i32 to index
      %c0_58 = arith.constant 0 : index
      %c0_59 = arith.constant 0 : index
      %153 = vector.load %arg17[%152, %c0_58, %c0_59] : memref<15x8x16xf32, #tpu.memory_space<vmem>>, vector<1x8x16xf32>
      %154 = vector.shape_cast %153 : vector<1x8x16xf32> to vector<8x16xf32>
      %155 = vector.shape_cast %129 : vector<8x16xf32> to vector<1x8x16xf32>
      tpu.vector_store %arg17[%152, %c0_58, %c0_59], %155 {strides = array<i32>} : memref<15x8x16xf32, #tpu.memory_space<vmem>>, vector<1x8x16xf32>,
      %156 = arith.index_cast %arg19 : i32 to index
      %c0_60 = arith.constant 0 : index
      %c0_61 = arith.constant 0 : index
      %157 = vector.load %arg18[%156, %c0_60, %c0_61] : memref<15x8x1xi32, #tpu.memory_space<vmem>>, vector<1x8x1xi32>
      %158 = vector.shape_cast %157 : vector<1x8x1xi32> to vector<8x1xi32>
      %159 = vector.shape_cast %147 : vector<8x1xi32> to vector<1x8x1xi32>
      tpu.vector_store %arg18[%156, %c0_60, %c0_61], %159 {strides = array<i32>} : memref<15x8x1xi32, #tpu.memory_space<vmem>>, vector<1x8x1xi32>,
      scf.yield %55, %147 : vector<8x32xf32>, vector<8x1xi32>
    }
    %c15_i32_30 = arith.constant 15 : i32
    return
  }
}

</mosaic_0001>

<bundles_post_ra>
// kernel: tpu_custom_call.1
= control target key start
LH: loop header
LB: loop body
LE: loop exit
PB: predicated region body
PF: predicated region fallthrough
CT: control target
= control target key end

     0   :  { %s3471_s0 = inlined_call_operand.hbm [shape: f32[8,16,32], index: 0, kind: input, shape index: {}]   ;;  %s3472_s1 = inlined_call_operand.hbm [shape: bf16[8,16,32], index: 1, kind: input, shape index: {}]   ;;  %s3473_s2 = inlined_call_operand.hbm [shape: f32[15,8,64], index: 2, kind: input, shape index: {}]   ;;  %s3474_s3 = inlined_call_operand.hbm [shape: f32[15,1,16], index: 3, kind: input, shape index: {}]   ;;  %s3475_s4 = inlined_call_operand.hbm [shape: s32[8,16], index: 4, kind: input, shape index: {}]   ;;  %s3476_s5 = inlined_call_operand.vmem [shape: s32[8,1], index: 5, kind: input, shape index: {}]   ;;  %s3477_s6 = inlined_call_operand.vmem [shape: f32[1,16], index: 6, kind: input, shape index: {}]   ;;  %s3478_s7 = inlined_call_operand.hbm [shape: f32[8,32], index: 7, kind: input, shape index: {}]   ;;  %s3479_s8 = inlined_call_operand.vmem [shape: bf16[64,128], index: 8, kind: input, shape index: {}]   ;;  %s3480_s9 = inlined_call_operand.hbm [shape: bf16[32,128], index: 9, kind: input, shape index: {}]   ;;  %s3481_s10 = inlined_call_operand.vmem [shape: f32[1,128], index: 10, kind: input, shape index: {}]   ;;  %s3482_s11 = inlined_call_operand.vmem [shape: bf16[32,64], index: 11, kind: input, shape index: {}]   ;;  %s3483_s12 = inlined_call_operand.vmem [shape: f32[1,32], index: 12, kind: input, shape index: {}]   ;;  %s3484_s13 = inlined_call_operand.vmem [shape: f32[1,32], index: 13, kind: input, shape index: {}]   ;;  %s3485_s14 = inlined_call_operand.hbm [shape: bf16[32,80], index: 14, kind: input, shape index: {}]   ;;  %s3486_s15 = inlined_call_operand.vmem [shape: f32[1,80], index: 15, kind: input, shape index: {}]   ;;  %s3487_s16 = inlined_call_operand.hbm [shape: f32[15,8,64], index: 16, kind: output, shape index: {0}]   ;;  %s3488_s17 = inlined_call_operand.hbm [shape: f32[15,8,16], index: 17, kind: output, shape index: {1}]   ;;  %s3489_s18 = inlined_call_operand.vmem [shape: s32[15,8,1], index: 18, kind: output, shape index: {2}]  }
   0x1   :  { %3514 = sst [smem:[#allocation69_spill]] %s3471_s0 }
   0x2   :  { %3515 = sst [smem:[#allocation70_spill]] %s3472_s1 }
   0x3   :  { %3516 = sst [smem:[#allocation71_spill]] %s3473_s2 }
   0x4   :  { %3517 = sst [smem:[#allocation72_spill]] %s3488_s17 }
   0x5   :  { %24 = vsyncpa [#allocation3], 0 }
   0x6   :  { %25 = vsyncpa [#allocation6], 0 }
   0x7   :  { %26 = vsyncpa [#allocation9], 0 }
   0x8   :  { %27 = vsyncpa [#allocation12], 0 }
   0x9   :  { %28 = vsyncpa [#allocation15], 0 }
   0xa   :  { %29 = vsyncpa [#allocation4], 0 }
   0xb   :  { %30 = vsyncpa [#allocation18], 0  ;;  %s2510_s27 = smov [#allocation5]   ;;  %s3518_s0 = sld [smem:[#allocation70_spill]] }
   0xc   :  { %s48_s28 = sshll.u32 %s2510_s27, 4  ;;  %s49_s28 = int_to_ptr.vmem [resolvable:$true] %s48_s28 }
  0x11   :  { %s2252_s19 = scalar_lea.hbm %s3518_s0, 1024 }
  0x12   :  { %p2253_p0 = scmp.ne.s32.totalorder %s3518_s0, %s2252_s19  ;;  %p2256_p1 = scmp.lt.u32.totalorder %s2252_s19, %s3518_s0 }
  0x14   :  { %p2258_p2 = pnand %p2256_p1, %p2253_p0 }
  0x16   :  { %2261 = shalt.err (!%p2258_p2)
}
  0x17   :  { %s2262_s2 = scalar_lea.vmem %s49_s28, 1024  ;;  %p2267_p4 = scmp.lt.s32.totalorder %s49_s28, %s49_s28 }
  0x18   :  { %p2263_p3 = scmp.ne.s32.totalorder %s49_s28, %s2262_s2  ;;  %p2268_p5 = scmp.lt.s32.totalorder %s2262_s2, %s2262_s2 }
  0x1a   :  { %p2269_p6 = por %p2268_p5, %p2267_p4 }
  0x1c   :  { %p2270_p7 = pnand %p2269_p6, %p2263_p3 }
  0x1e   :  { %2273 = shalt.err (!%p2270_p7)
}
  0x1f   :  { %s3494_s23 = smov 64   ;;  %s3496_s24 = smov 4  }
  0x20   :  { %54 = dma.hbm_to_vmem [thread:$0]  %s3518_s0, 1024, %s49_s28, [#allocation6], %s3494_s23, %s3494_s23, %s3496_s24  }
  0x21   :  { %s2513_s27 = smov [#allocation8]   ;;  %s2274_s1 = scalar_lea.hbm %s3474_s3, 240 }
  0x22   :  { %s72_s29 = sshll.u32 %s2513_s27, 4  ;;  %p2275_p8 = scmp.ne.s32.totalorder %s3474_s3, %s2274_s1  ;;  %s73_s29 = int_to_ptr.vmem [resolvable:$true] %s72_s29 }
  0x23   :  { %p2278_p9 = scmp.lt.u32.totalorder %s2274_s1, %s3474_s3 }
  0x25   :  { %p2280_p10 = pnand %p2278_p9, %p2275_p8 }
  0x27   :  { %2283 = shalt.err (!%p2280_p10)
}
  0x28   :  { %s2284_s17 = scalar_lea.vmem %s73_s29, 240  ;;  %s2288_s28 = scalar_lea.vmem %s73_s29, 256 }
  0x29   :  { %p2285_p11 = scmp.ne.s32.totalorder %s73_s29, %s2284_s17  ;;  %p2289_p12 = scmp.lt.s32.totalorder %s73_s29, %s73_s29 }
  0x2a   :  { %p2290_p13 = scmp.lt.s32.totalorder %s2288_s28, %s2284_s17 }
  0x2c   :  { %p2291_p0 = por %p2290_p13, %p2289_p12 }
  0x2e   :  { %p2292_p1 = pnand %p2291_p0, %p2285_p11 }
  0x30   :  { %2295 = shalt.err (!%p2292_p1)
}
  0x31   :  { %s2514_s0 = smov 16   ;;  %s2515_s25 = smov 1  }
  0x32   :  { %78 = dma.hbm_to_vmem [thread:$0]  %s3474_s3, 240, %s73_s29, [#allocation9], %s2514_s0, %s2514_s0, %s2515_s25  }
  0x33   :  { %s2516_s30 = smov [#allocation11]   ;;  %s2517_s20 = smov [#allocation2]  }
  0x34   :  { %s99_s19 = sshll.u32 %s2516_s30, 4  ;;  %s36_s1 = sshll.u32 %s2517_s20, 4  ;;  %s100_s19 = int_to_ptr.vmem [resolvable:$true] %s99_s19  ;;  %s2655_s1 = int_to_ptr.vmem [resolvable:$true] %s36_s1 }
  0x35   :  { %s2296_s17 = scalar_lea.hbm %s3478_s7, 128 }
  0x36   :  { %p2297_p2 = scmp.ne.s32.totalorder %s3478_s7, %s2296_s17  ;;  %p2300_p3 = scmp.lt.u32.totalorder %s2296_s17, %s3478_s7 }
  0x38   :  { %p2302_p4 = pnand %p2300_p3, %p2297_p2 }
  0x3a   :  { %2305 = shalt.err (!%p2302_p4)
}
  0x3b   :  { %s2306_s3 = scalar_lea.vmem %s100_s19, 128  ;;  %p2311_p6 = scmp.lt.s32.totalorder %s100_s19, %s100_s19 }
  0x3c   :  { %p2307_p5 = scmp.ne.s32.totalorder %s100_s19, %s2306_s3  ;;  %p2312_p7 = scmp.lt.s32.totalorder %s2306_s3, %s2306_s3 }
  0x3e   :  { %p2313_p8 = por %p2312_p7, %p2311_p6 }
  0x40   :  { %p2314_p9 = pnand %p2313_p8, %p2307_p5 }
  0x42   :  { %2317 = shalt.err (!%p2314_p9)
}
  0x43   :  { %102 = dma.hbm_to_vmem [thread:$0]  %s3478_s7, 128, %s100_s19, [#allocation12]  }
  0x44   :  { %s3519_s27 = sld [smem:[#allocation69_spill]] }
  0x4a   :  { %s2318_s30 = scalar_lea.hbm %s3519_s27, 2048 }
  0x4b   :  { %p2319_p10 = scmp.ne.s32.totalorder %s3519_s27, %s2318_s30  ;;  %p2322_p11 = scmp.lt.u32.totalorder %s2318_s30, %s3519_s27 }
  0x4d   :  { %p2324_p12 = pnand %p2322_p11, %p2319_p10 }
  0x4f   :  { %2327 = shalt.err (!%p2324_p12)
}
  0x50   :  { %s2328_s22 = scalar_lea.vmem %s2655_s1, 2048  ;;  %p2333_p0 = scmp.lt.s32.totalorder %s2655_s1, %s2655_s1 }
  0x51   :  { %p2329_p13 = scmp.ne.s32.totalorder %s2655_s1, %s2328_s22  ;;  %p2334_p1 = scmp.lt.s32.totalorder %s2328_s22, %s2328_s22 }
  0x53   :  { %p2335_p2 = por %p2334_p1, %p2333_p0 }
  0x55   :  { %p2336_p3 = pnand %p2335_p2, %p2329_p13 }
  0x57   :  { %2339 = shalt.err (!%p2336_p3)
}
  0x58   :  { %s2518_s7 = smov 128   ;;  %s2519_s19 = smov 8  }
  0x59   :  { %42 = dma.hbm_to_vmem [thread:$0]  %s3519_s27, 2048, %s2655_s1, [#allocation3], %s2518_s7, %s2518_s7, %s2519_s19  }
  0x5a   :  { %s2520_s28 = smov [#allocation7]   ;;  %s2521_s29 = smov [#allocation10]  }
  0x5b   :  { %s60_s3 = sshll.u32 %s2520_s28, 4  ;;  %s85_s0 = sshll.u32 %s2521_s29, 4  ;;  %s61_s3 = int_to_ptr.vmem [resolvable:$true] %s60_s3  ;;  %s86_s0 = int_to_ptr.vmem [resolvable:$true] %s85_s0 }
  0x5c   :  { %s3520_s30 = sld [smem:[#allocation71_spill]] }
  0x62   :  { %s2340_s20 = scalar_lea.hbm %s3520_s30, 1920 }
  0x63   :  { %p2341_p4 = scmp.ne.s32.totalorder %s3520_s30, %s2340_s20  ;;  %p2344_p5 = scmp.lt.u32.totalorder %s2340_s20, %s3520_s30 }
  0x65   :  { %p2346_p6 = pnand %p2344_p5, %p2341_p4 }
  0x67   :  { %2349 = shalt.err (!%p2346_p6)
}
  0x68   :  { %s2350_s1 = scalar_lea.vmem %s61_s3, 1920  ;;  %p2355_p8 = scmp.lt.s32.totalorder %s61_s3, %s61_s3 }
  0x69   :  { %p2351_p7 = scmp.ne.s32.totalorder %s61_s3, %s2350_s1  ;;  %p2356_p9 = scmp.lt.s32.totalorder %s2350_s1, %s2350_s1 }
  0x6b   :  { %p2357_p10 = por %p2356_p9, %p2355_p8 }
  0x6d   :  { %p2358_p11 = pnand %p2357_p10, %p2351_p7 }
  0x6f   :  { %2361 = shalt.err (!%p2358_p11)
}
  0x70   :  { %66 = dma.hbm_to_vmem [thread:$0]  %s3520_s30, 1920, %s61_s3, [#allocation6], %s2518_s7, %s2518_s7, %s2519_s19  }
  0x71   :  { %s2362_s29 = scalar_lea.hbm %s3475_s4, 128 }
  0x72   :  { %p2363_p12 = scmp.ne.s32.totalorder %s3475_s4, %s2362_s29  ;;  %p2366_p13 = scmp.lt.u32.totalorder %s2362_s29, %s3475_s4 }
  0x74   :  { %p2368_p0 = pnand %p2366_p13, %p2363_p12 }
  0x76   :  { %2371 = shalt.err (!%p2368_p0)
}
  0x77   :  { %s2372_s24 = scalar_lea.vmem %s86_s0, 128  ;;  %p2377_p2 = scmp.lt.s32.totalorder %s86_s0, %s86_s0 }
  0x78   :  { %p2373_p1 = scmp.ne.s32.totalorder %s86_s0, %s2372_s24  ;;  %p2378_p3 = scmp.lt.s32.totalorder %s2372_s24, %s2372_s24 }
  0x7a   :  { %p2379_p4 = por %p2378_p3, %p2377_p2 }
  0x7c   :  { %p2380_p5 = pnand %p2379_p4, %p2373_p1 }
  0x7e   :  { %2383 = shalt.err (!%p2380_p5)
}
  0x7f   :  { %88 = dma.hbm_to_vmem [thread:$0]  %s3475_s4, 128, %s86_s0, [#allocation9]  }
  0x80   :  { %s2522_s21 = smov [#allocation13]   ;;  %s2523_s1 = smov [#allocation14]  }
  0x81   :  { %s110_s22 = sshll.u32 %s2522_s21, 4  ;;  %s130_s27 = sshll.u32 %s2523_s1, 4  ;;  %s111_s22 = int_to_ptr.vmem [resolvable:$true] %s110_s22  ;;  %s2716_s27 = int_to_ptr.vmem [resolvable:$true] %s130_s27 }
  0x82   :  { %s2384_s28 = scalar_lea.hbm %s3480_s9, 256 }
  0x83   :  { %p2385_p6 = scmp.ne.s32.totalorder %s3480_s9, %s2384_s28  ;;  %p2388_p7 = scmp.lt.u32.totalorder %s2384_s28, %s3480_s9 }
  0x85   :  { %p2390_p8 = pnand %p2388_p7, %p2385_p6 }
  0x87   :  { %2393 = shalt.err (!%p2390_p8)
}
  0x88   :  { %s2394_s4 = scalar_lea.vmem %s111_s22, 256  ;;  %p2399_p10 = scmp.lt.s32.totalorder %s111_s22, %s111_s22 }
  0x89   :  { %p2395_p9 = scmp.ne.s32.totalorder %s111_s22, %s2394_s4  ;;  %p2400_p11 = scmp.lt.s32.totalorder %s2394_s4, %s2394_s4 }
  0x8b   :  { %p2401_p12 = por %p2400_p11, %p2399_p10 }
  0x8d   :  { %p2402_p13 = pnand %p2401_p12, %p2395_p9 }
  0x8f   :  { %2405 = shalt.err (!%p2402_p13)
}
  0x90   :  { %s3521_s0 = smov 4   ;;  %s3522_s23 = smov 64  }
  0x91   :  { %116 = dma.hbm_to_vmem [thread:$0]  %s3480_s9, 256, %s111_s22, [#allocation12], %s3522_s23, %s3522_s23, %s3521_s0  }
  0x92   :  { %s2406_s1 = scalar_lea.hbm %s3485_s14, 256 }
  0x93   :  { %p2407_p0 = scmp.ne.s32.totalorder %s3485_s14, %s2406_s1  ;;  %p2410_p1 = scmp.lt.u32.totalorder %s2406_s1, %s3485_s14 }
  0x95   :  { %p2412_p2 = pnand %p2410_p1, %p2407_p0 }
  0x97   :  { %2415 = shalt.err (!%p2412_p2)
}
  0x98   :  { %s2416_s25 = scalar_lea.vmem %s2716_s27, 256  ;;  %p2421_p4 = scmp.lt.s32.totalorder %s2716_s27, %s2716_s27 }
  0x99   :  { %p2417_p3 = scmp.ne.s32.totalorder %s2716_s27, %s2416_s25  ;;  %p2422_p5 = scmp.lt.s32.totalorder %s2416_s25, %s2416_s25 }
  0x9b   :  { %p2423_p6 = por %p2422_p5, %p2421_p4 }
  0x9d   :  { %p2424_p7 = pnand %p2423_p6, %p2417_p3 }
  0x9f   :  { %2427 = shalt.err (!%p2424_p7)
}
  0xa0   :  { %136 = dma.hbm_to_vmem [thread:$0]  %s3485_s14, 256, %s2716_s27, [#allocation15], %s3522_s23, %s3522_s23, %s3521_s0  }
  0xa1   :  { %2484 = dma.done.wait [#allocation3], 2048  }
  0xa2   :  { %2485 = vsyncadd [#allocation3], 4294965248 }
  0xa3   :  { %2486 = dma.done.wait [#allocation6], 2944  }
  0xa4   :  { %2487 = vsyncadd [#allocation6], 4294964352 }
  0xa5   :  { %2488 = dma.done.wait [#allocation9], 368  }
  0xa6   :  { %2489 = vsyncadd [#allocation9], 4294966928 }
  0xa7   :  { %2490 = dma.done.wait [#allocation12], 384  }
  0xa8   :  { %2491 = vsyncadd [#allocation12], 4294966912 }
  0xa9   :  { %2492 = dma.done.wait [#allocation15], 256  }
  0xaa   :  { %2493 = vsyncadd [#allocation15], 4294967040  ;;  %v3498_v0 = vlaneseq  ;;  %v2756_v2 = vld [vmem:[#allocation2] sm:$0xff]  ;;  %v2758_v3 = vld [vmem:[#allocation2 + $0x8] sm:$0xff]  ;;  %v2928_v62 = vmov 1  }
  0xab   :  { %3524 = vst [vmem:[#allocation27_spill] sm:$0xff] %v2756_v2  ;;  %3525 = vst [vmem:[#allocation28_spill] sm:$0xff] %v2758_v3  ;;  %v2760_v4 = vld [vmem:[#allocation2 + $0x10] sm:$0xff]  ;;  %v2762_v5 = vld [vmem:[#allocation2 + $0x18] sm:$0xff] }
  0xac   :  { %v2754_v1 = vand.u32 127, %v3498_v0  ;;  %3526 = vst [vmem:[#allocation29_spill] sm:$0xff] %v2760_v4  ;;  %3527 = vst [vmem:[#allocation30_spill] sm:$0xff] %v2762_v5  ;;  %v2764_v6 = vld [vmem:[#allocation2 + $0x20] sm:$0xff]  ;;  %v2766_v7 = vld [vmem:[#allocation2 + $0x28] sm:$0xff] }
  0xad   :  { %3528 = vst [vmem:[#allocation31_spill] sm:$0xff] %v2764_v6  ;;  %3529 = vst [vmem:[#allocation32_spill] sm:$0xff] %v2766_v7  ;;  %v2768_v8 = vld [vmem:[#allocation2 + $0x30] sm:$0xff]  ;;  %v2770_v9 = vld [vmem:[#allocation2 + $0x38] sm:$0xff] }
  0xae   :  { %3523 = vst [vmem:[#allocation26_spill] sm:$0xff] %v2754_v1  ;;  %3530 = vst [vmem:[#allocation33_spill] sm:$0xff] %v2768_v8  ;;  %v2772_v10 = vld [vmem:[#allocation2 + $0x40] sm:$0xff]  ;;  %v2774_v11 = vld [vmem:[#allocation2 + $0x48] sm:$0xff] }
  0xaf   :  { %3531 = vst [vmem:[#allocation34_spill] sm:$0xff] %v2770_v9  ;;  %3532 = vst [vmem:[#allocation35_spill] sm:$0xff] %v2772_v10  ;;  %v2776_v12 = vld [vmem:[#allocation2 + $0x50] sm:$0xff]  ;;  %v2778_v13 = vld [vmem:[#allocation2 + $0x58] sm:$0xff] }
  0xb0   :  { %3533 = vst [vmem:[#allocation36_spill] sm:$0xff] %v2774_v11  ;;  %3534 = vst [vmem:[#allocation37_spill] sm:$0xff] %v2776_v12  ;;  %v2780_v14 = vld [vmem:[#allocation2 + $0x60] sm:$0xff]  ;;  %v2782_v15 = vld [vmem:[#allocation2 + $0x68] sm:$0xff] }
  0xb1   :  { %3535 = vst [vmem:[#allocation38_spill] sm:$0xff] %v2778_v13  ;;  %3536 = vst [vmem:[#allocation39_spill] sm:$0xff] %v2780_v14  ;;  %v2784_v16 = vld [vmem:[#allocation2 + $0x70] sm:$0xff]  ;;  %v2786_v17 = vld [vmem:[#allocation2 + $0x78] sm:$0xff] }
  0xb2   :  { %3537 = vst [vmem:[#allocation40_spill] sm:$0xff] %v2782_v15  ;;  %3538 = vst [vmem:[#allocation41_spill] sm:$0xff] %v2784_v16  ;;  %v2788_v18 = vld [vmem:[#allocation5] sm:$0xf]  ;;  %v2790_v19 = vld [vmem:[#allocation5 + $0x4] sm:$0xf] }
  0xb3   :  { %3539 = vst [vmem:[#allocation42_spill] sm:$0xff] %v2786_v17  ;;  %v2792_v20 = vld [vmem:[#allocation5 + $0x8] sm:$0xf]  ;;  %v2794_v21 = vld [vmem:[#allocation5 + $0xc] sm:$0xf]  ;;  %v2830_v36 = vld [vmem:[%s3476_s5] sm:$0xff] }
  0xb4   :  { %v2796_v22 = vld [vmem:[#allocation5 + $0x10] sm:$0xf]  ;;  %v2798_v23 = vld [vmem:[#allocation5 + $0x14] sm:$0xf]  ;;  %v2800_v24 = vld [vmem:[#allocation5 + $0x18] sm:$0xf] }
  0xb5   :  { %v2802_v25 = vld [vmem:[#allocation5 + $0x1c] sm:$0xf]  ;;  %v2804_v26 = vld [vmem:[#allocation5 + $0x20] sm:$0xf]  ;;  %v2806_v27 = vld [vmem:[#allocation5 + $0x24] sm:$0xf] }
  0xb6   :  { %v2808_v28 = vld [vmem:[#allocation5 + $0x28] sm:$0xf]  ;;  %v2810_v29 = vld [vmem:[#allocation5 + $0x2c] sm:$0xf]  ;;  %v2812_v30 = vld [vmem:[#allocation5 + $0x30] sm:$0xf] }
  0xb7   :  { %v2814_v31 = vld [vmem:[#allocation5 + $0x34] sm:$0xf]  ;;  %v2816_v32 = vld [vmem:[#allocation5 + $0x38] sm:$0xf]  ;;  %v2818_v33 = vld [vmem:[#allocation5 + $0x3c] sm:$0xf] }
  0xb8   :  { %v2823_v34 = vld [vmem:[%s3477_s6] ss:$0 sm:$0xff]  ;;  %v2825_v35 = vld [vmem:[#allocation10] sm:$0xff]  ;;  %3542 = vst [vmem:[#allocation45_spill] sm:$0xff] %v2830_v36  ;;  %v2840_v38 = vld [vmem:[%s3479_s8 + $0x4] sm:$0xf] }
  0xb9   :  { %3540 = vst [vmem:[#allocation43_spill] sm:$0xff] %v2823_v34  ;;  %3541 = vst [vmem:[#allocation44_spill] sm:$0xff] %v2825_v35  ;;  %v2835_v37 = vld [vmem:[%s3479_s8] sm:$0xf]  ;;  %v2845_v39 = vld [vmem:[%s3479_s8 + $0x8] sm:$0xf] }
  0xba   :  { %3543 = vst [vmem:[#allocation46_spill] sm:$0xff] %v2835_v37  ;;  %3544 = vst [vmem:[#allocation47_spill] sm:$0xff] %v2840_v38  ;;  %v2850_v40 = vld [vmem:[%s3479_s8 + $0xc] sm:$0xf]  ;;  %v2855_v41 = vld [vmem:[%s3479_s8 + $0x10] sm:$0xf] }
  0xbb   :  { %3545 = vst [vmem:[#allocation48_spill] sm:$0xff] %v2845_v39  ;;  %3546 = vst [vmem:[#allocation49_spill] sm:$0xff] %v2850_v40  ;;  %v2860_v42 = vld [vmem:[%s3479_s8 + $0x14] sm:$0xf]  ;;  %v2865_v43 = vld [vmem:[%s3479_s8 + $0x18] sm:$0xf] }
  0xbc   :  { %3547 = vst [vmem:[#allocation50_spill] sm:$0xff] %v2855_v41  ;;  %3548 = vst [vmem:[#allocation51_spill] sm:$0xff] %v2860_v42  ;;  %v2870_v44 = vld [vmem:[%s3479_s8 + $0x1c] sm:$0xf]  ;;  %v2872_v45 = vld [vmem:[#allocation13] sm:$0xf] }
  0xbd   :  { %3549 = vst [vmem:[#allocation52_spill] sm:$0xff] %v2865_v43  ;;  %3550 = vst [vmem:[#allocation53_spill] sm:$0xff] %v2870_v44  ;;  %v2874_v46 = vld [vmem:[#allocation13 + $0x4] sm:$0xf]  ;;  %v2876_v47 = vld [vmem:[#allocation13 + $0x8] sm:$0xf] }
  0xbe   :  { %3551 = vst [vmem:[#allocation54_spill] sm:$0xff] %v2872_v45  ;;  %3552 = vst [vmem:[#allocation55_spill] sm:$0xff] %v2874_v46  ;;  %v2878_v48 = vld [vmem:[#allocation13 + $0xc] sm:$0xf]  ;;  %v2883_v49 = vld [vmem:[%s3481_s10] ss:$0 sm:$0xff] }
  0xbf   :  { %3553 = vst [vmem:[#allocation56_spill] sm:$0xff] %v2876_v47  ;;  %3554 = vst [vmem:[#allocation57_spill] sm:$0xff] %v2878_v48  ;;  %v2888_v50 = vld [vmem:[%s3482_s11] sm:$0xf]  ;;  %v2893_v51 = vld [vmem:[%s3482_s11 + $0x4] sm:$0xf] }
  0xc0   :  { %3555 = vst [vmem:[#allocation58_spill] sm:$0xff] %v2883_v49  ;;  %3556 = vst [vmem:[#allocation59_spill] sm:$0xff] %v2888_v50  ;;  %v2898_v52 = vld [vmem:[%s3482_s11 + $0x8] sm:$0xf]  ;;  %v2903_v53 = vld [vmem:[%s3482_s11 + $0xc] sm:$0xf] }
  0xc1   :  { %3557 = vst [vmem:[#allocation60_spill] sm:$0xff] %v2893_v51  ;;  %3558 = vst [vmem:[#allocation61_spill] sm:$0xff] %v2898_v52  ;;  %v2908_v54 = vld [vmem:[%s3483_s12] ss:$0 sm:$0xff]  ;;  %v2915_v56 = vld [vmem:[#allocation14] sm:$0xf] }
  0xc2   :  { %3559 = vst [vmem:[#allocation62_spill] sm:$0xff] %v2903_v53  ;;  %3560 = vst [vmem:[#allocation63_spill] sm:$0xff] %v2908_v54  ;;  %v2913_v55 = vld [vmem:[%s3484_s13] ss:$0 sm:$0xff]  ;;  %v2917_v57 = vld [vmem:[#allocation14 + $0x4] sm:$0xf] }
  0xc3   :  { %v2919_v58 = vld [vmem:[#allocation14 + $0x8] sm:$0xf]  ;;  %v2921_v59 = vld [vmem:[#allocation14 + $0xc] sm:$0xf]  ;;  %v2926_v60 = vld [vmem:[%s3486_s15] ss:$0 sm:$0xff] }
  0xc4   :  { %3561 = vst [vmem:[#allocation64_spill] sm:$0xff] %v2919_v58  ;;  %3562 = vst [vmem:[#allocation65_spill] sm:$0xff] %v2921_v59  ;;  %v225_v61 = vld [vmem:[#allocation11] sm:$0xff]   ;;  %s2932_s12 = smov 0  }
  0xc5   :  { %3563 = vst [vmem:[#allocation66_spill] sm:$0xff] %v2926_v60 }
  0xc6 LB: > { %v3564_v1 = vld [vmem:[#allocation26_spill] sm:$0xff]  ;;  %v3566_v34 = vld [vmem:[#allocation43_spill] sm:$0xff]  ;;  %v2524_v0 = vmov 0   ;;  %v3499_v36 = vmov 0.0   ;;  %v3571_v40 = vld [vmem:[#allocation49_spill] sm:$0xff]  ;;  %vm2526_vm0 = vmmov 0   ;;  %s2508_s12 = sphi %s2932_s12, %s231_s12   ;;  %v2504_v61 = vphi %v225_v61, %v1902_v61   ;;  %v2500_v62 = vphi %v2928_v62, %v1888_v62  }
  0xc7   : > { %v3567_v38 = vld [vmem:[#allocation47_spill] sm:$0xff]  ;;  %v3568_v37 = vld [vmem:[#allocation46_spill] sm:$0xff]  ;;  %2166 = vset.pattern.permute.xlu0 %v2524_v0  ;;  %2043 = vmatprep.subr.bf16.mxu1 %v3499_v36  ;;  %v3572_v39 = vld [vmem:[#allocation48_spill] sm:$0xff]  ;;  %s2527_s13 = smov 32   ;;  %vm254_vm1 = vcmask 261120   ;;  %vm322_vm3 = vcmask 523264  }
  0xc8   : > { %v1969_v63 = vcombine.low %v3568_v37, %v3567_v38  ;;  %v3569_v46 = vld [vmem:[#allocation55_spill] sm:$0xff]  ;;  %v3570_v45 = vld [vmem:[#allocation54_spill] sm:$0xff]  ;;  %235 = vperm.xlu0 %2166, %v2500_v62   ;;  %v1970_v60 = vcombine.low %v3572_v39, %v3571_v40  ;;  %2035 = vmatprep.subr.bf16.mxu0 %v3499_v36  ;;  %v3573_v48 = vld [vmem:[#allocation57_spill] sm:$0xff]  ;;  %s2528_s15 = smov 64   ;;  %vm755_vm4 = vcmask 130112   ;;  %vm820_vm5 = vcmask 1041409  }
  0xc9   : > { %v3565_v54 = vld [vmem:[#allocation63_spill] sm:$0xff]  ;;  %v1966_v35 = vcombine.low %v3570_v45, %v3569_v46  ;;  %v3574_v47 = vld [vmem:[#allocation56_spill] sm:$0xff]  ;;  %2039 = vmatprep.mubr.msk.bf16.mxu0 %vm2526_vm0, %v3499_v36  ;;  %2051 = vmatprep.mubr.msk.bf16.mxu1 %vm2526_vm0, %v3499_v36  ;;  %v3576_v41 = vld [vmem:[#allocation50_spill] sm:$0xff]  ;;  %vm822_vm6 = vcmask 1042434   ;;  %vm824_vm7 = vcmask 1043459   ;;  %vm826_vm8 = vcmask 1044484  }
  0xca   : > { %2044 = vmatpush3.bf16.msra.mxu1 %v1969_v63  ;;  %v1967_v37 = vcombine.low %v3574_v47, %v3573_v48  ;;  %v3575_v42 = vld [vmem:[#allocation51_spill] sm:$0xff]  ;;  %2167 = vset.pattern.permute.xlu1 %v2524_v0  ;;  %v3577_v44 = vld [vmem:[#allocation53_spill] sm:$0xff]  ;;  %v3578_v43 = vld [vmem:[#allocation52_spill] sm:$0xff]  ;;  %vm828_vm9 = vcmask 1045509   ;;  %vm830_vm10 = vcmask 1046534   ;;  %vm832_vm11 = vcmask 1047559  }
  0xcb   : > { %2045 = vmatprep.subr.bf16.mxu1 %v3499_v36  ;;  %2036 = vmatpush3.bf16.msra.mxu0 %v1966_v35  ;;  %v1971_v62 = vcombine.low %v3576_v41, %v3575_v42  ;;  %v241_v35 = vpack.c.bf16 %v2504_v61, %v2504_v61  ;;  %v1972_v63 = vcombine.low %v3578_v43, %v3577_v44  ;;  %v3579_v49 = vld [vmem:[#allocation58_spill] sm:$0xff]  ;;  %v3580_v51 = vld [vmem:[#allocation60_spill] sm:$0xff]  ;;  %v3581_v50 = vld [vmem:[#allocation59_spill] sm:$0xff]  ;;  %vm835_vm12 = vcmask 130048   ;;  %s1822_s5 = scalar_lea.vmem [#allocation8], %s2508_s12  ;;  %s2530_s1 = smov 96  }
  0xcc   : > { %2037 = vmatprep.subr.bf16.mxu0 %v3499_v36  ;;  %381 = vrot.lane.b32.xlu1 %v2504_v61, %s2527_s13  ;;  %v3582_v53 = vld [vmem:[#allocation62_spill] sm:$0xff]  ;;  %v3583_v52 = vld [vmem:[#allocation61_spill] sm:$0xff]  ;;  %v3588_v3 = vld [vmem:[#allocation28_spill] sm:$0xff]  ;;  %vm1833_vm13 = vcmask 654848   ;;  %s3405_s17 = sshll.u32 %s2508_s12, 3  ;;  %s231_s12 = sadd.s32 1, %s2508_s12  }
  0xcd   : > { %v3589_v2 = vld [vmem:[#allocation27_spill] sm:$0xff]  ;;  %v3591_v4 = vld [vmem:[#allocation29_spill] sm:$0xff]  ;;  %v3592_v5 = vld [vmem:[#allocation30_spill] sm:$0xff]  ;;  %s1799_s2 = scalar_lea.vmem [#allocation7], %s3405_s17  ;;  %s1889_s28 = scalar_lea.vmem [#allocation16], %s3405_s17 }
  0xce   : > { %2046 = vmatpush3.bf16.msra.mxu1 %v1970_v60  ;;  %v3590_v6 = vld [vmem:[#allocation31_spill] sm:$0xff]  ;;  %v3594_v8 = vld [vmem:[#allocation33_spill] sm:$0xff]  ;;  %v3595_v7 = vld [vmem:[#allocation32_spill] sm:$0xff]  ;;  %s1895_s29 = scalar_lea.vmem [#allocation17], %s3405_s17  ;;  %s1897_s22 = scalar_lea.vmem %s3489_s18, %s3405_s17 }
  0xcf   : > { %2047 = vmatprep.subr.bf16.mxu1 %v3499_v36  ;;  %2038 = vmatpush3.bf16.msra.mxu0 %v1967_v37  ;;  %v3593_v10 = vld [vmem:[#allocation35_spill] sm:$0xff]  ;;  %v3596_v12 = vld [vmem:[#allocation37_spill] sm:$0xff]  ;;  %v3597_v11 = vld [vmem:[#allocation36_spill] sm:$0xff]  ;;  %p228_p8 = scmp.ge.s32.totalorder %s231_s12, 15  }
  0xd0   : > { %2055 = vmatprep.subr.bf16.mxu0 %v3499_v36  ;;  %v3598_v14 = vld [vmem:[#allocation39_spill] sm:$0xff]  ;;  %v3599_v9 = vld [vmem:[#allocation34_spill] sm:$0xff]  ;;  %v3600_v16 = vld [vmem:[#allocation41_spill] sm:$0xff]  ;;  %s2531_s14 = smov (%p228_p8), [#allocation16]   ;;  %s2532_s26 = smov (%p228_p8), [#allocation17]  }
  0xd1   : > { %v3601_v13 = vld [vmem:[#allocation38_spill] sm:$0xff]  ;;  %v3602_v15 = vld [vmem:[#allocation40_spill] sm:$0xff]  ;;  %s1909_s27 = sshll.u32 (%p228_p8), %s2531_s14, 4  ;;  %s1921_s8 = sshll.u32 (%p228_p8), %s2532_s26, 4  ;;  %s1910_s27 = int_to_ptr.vmem [resolvable:$true] %s1909_s27  ;;  %s3434_s8 = int_to_ptr.vmem [resolvable:$true] %s1921_s8 }
  0xd2   : > { %2048 = vmatpush3.bf16.msra.mxu1 %v1971_v62  ;;  %2040 = vmatmul.mubr.msk.bf16.vlgmr.msra.gmra.mrb[0].mxu0 %vm254_vm1, %v241_v35  ;;  %v3603_v17 = vld [vmem:[#allocation42_spill] sm:$0xff]  ;;  %s2428_s20 = scalar_lea.vmem (%p228_p8), %s1910_s27, 1920  ;;  %p2433_p10 = scmp.lt.s32.totalorder (%p228_p8), %s1910_s27, %s1910_s27 }
  0xd3   : > { %2049 = vmatprep.subr.bf16.mxu1 %v3499_v36  ;;  %2059 = vmatprep.mubr.msk.bf16.mxu0 %vm2526_vm0, %v3499_v36  ;;  %p2429_p9 = scmp.ne.s32.totalorder (%p228_p8), %s1910_s27, %s2428_s20  ;;  %p2434_p11 = scmp.lt.s32.totalorder (%p228_p8), %s2428_s20, %s2428_s20 }
  0xd5   :  { %p2435_p12 = por (%p228_p8), %p2434_p11, %p2433_p10 }
  0xd6   : > { %2050 = vmatpush3.bf16.msra.mxu1 %v1972_v63 }
  0xd7   : > { %2069 = vmatprep.subr.bf16.mxu1 %v3499_v36  ;;  %p2436_p13 = pnand (%p228_p8), %p2435_p12, %p2429_p9 }
 0x147   : > { %v236_v0 = vpop.permute.xlu0 %235 }
 0x148   : > { %vm237_vm2 = vcmp.eq.s32.totalorder %v3564_v1, %v236_v0 }
 0x149   : > { %v1965_v37 = vsel %vm237_vm2, 1.0, %v3499_v36 }
 0x14a   : > { %v240_v60 = vpack.c.bf16 %v1965_v37, %v1965_v37 }
 0x14c   : > { %2052 = vmatmul.mubr.msk.bf16.vlgmr.msra.gmra.mrb[0].mxu1 %vm322_vm3, %v240_v60 }
 0x14d   : > { %2071 = vmatprep.mubr.msk.bf16.mxu1 %vm2526_vm0, %v3499_v36 }
 0x1a5   : > { %v292_v61 = vpop.f32.mrb[0].mxu0 }
 0x1a6   : > { %v2041_v62 = vpop.f32.mrb[1].mxu0 }
 0x1a7   : > { %v295_v35 = vpop.f32.mrb[2].mxu0 }
 0x1a8   : > { %v2042_v38 = vpop.f32.mrb[3].mxu0 }
 0x21f   : > { %v360_v39 = vpop.f32.mrb[0].mxu1 }
 0x220   : > { %v361_v63 = vadd.f32 %v360_v39, %v292_v61  ;;  %v2053_v40 = vpop.f32.mrb[1].mxu1  ;;  %v382_v39 = vpop.permute.xlu1 %381 }
 0x221   : > { %v363_v41 = vpop.f32.mrb[2].mxu1 }
 0x222   : > { %v372_v42 = vadd.f32 %v3579_v49, %v361_v63  ;;  %v2054_v0 = vpop.f32.mrb[3].mxu1  ;;  %v1976_v63 = vcombine.low %v3581_v50, %v3580_v51 }
 0x224   : > { %2168 = vtanh.f32 %v372_v42  ;;  %v1975_v37 = vmul.f32 -1.442695, %v372_v42  ;;  %2056 = vmatpush3.bf16.msra.mxu0 %v1976_v63  ;;  %v1977_v42 = vcombine.low %v3583_v52, %v3582_v53 }
 0x226   : > { %2170 = vpow2.f32 %v1975_v37 }
 0x22e   : > { %v2169_v43 = vpop.eup %2168 }
 0x22f   : > { %386 = vrot.lane.b32.xlu0 %v2169_v43, %s2528_s15  ;;  %v3584_v43 = vmov 0.0  }
 0x230   : > { %v2171_v60 = vpop.eup %2170  ;;  %2057 = vmatprep.subr.bf16.mxu0 %v3584_v43 }
 0x231   : > { %v376_v36 = vadd.f32 1.0, %v2171_v60  ;;  %2058 = vmatpush3.bf16.msra.mxu0 %v1977_v42 }
 0x232   : > { %2063 = vmatprep.subr.bf16.mxu0 %v3584_v43 }
 0x233   : > { %2172 = vrcp.f32 %v376_v36 }
 0x23d   : > { %v2173_v62 = vpop.eup %2172 }
 0x23e   : > { %v384_v40 = vmul.f32 %v2173_v62, %v382_v39 }
 0x2a1   : > { %v387_v35 = vpop.permute.xlu0 %386 }
 0x2a2   : > { %v389_v38 = vmul.f32 %v2173_v62, %v387_v35 }
 0x2a4   : > { %391 = vrot.lane.b32.xlu1 %v389_v38, %s2527_s13  ;;  %v2529_v38 = vmov 1966171168  }
 0x2a5   : > { %v463_v39 = vunpack.c.l.s4 %v2529_v38 }
 0x316   : > { %v392_v41 = vpop.permute.xlu1 %391 }
 0x317   : > { %v394_v61 = vadd.f32 %v392_v41, %v384_v40  ;;  %v464_v40 = vunpack.c.0.s8 %v463_v39  ;;  %v3586_v41 = vlaneseq }
 0x319   : > { %2174 = vtanh.f32 %v394_v61  ;;  %v2991_v61 = vshrl.u32 %v3586_v41, 7 }
 0x323   : > { %v2175_v36 = vpop.eup %2174 }
 0x324   : > { %397 = vrot.lane.b32.xlu0 %v2175_v36, %s2528_s15 }
 0x396   : > { %v398_v0 = vpop.permute.xlu0 %397 }
 0x397   : > { %v2982_v37 = vmul.f32 %v2173_v62, %v398_v0  ;;  %v467_v62 = vsub.s32 %v464_v40, %v2991_v61 }
 0x399   : > { %3585 = vst [vmem:[#allocation67_spill] sm:$0xff] %v2982_v37  ;;  %v401_v60 = vpack.c.bf16 %v2982_v37, %v2982_v37 }
 0x39b   : > { %403 = vrot.lane.b32.xlu1 %v401_v60, %s2527_s13  ;;  %v3000_v60 = vsub.s32 0, %v2991_v61 }
 0x40d   : > { %v404_v35 = vpop.permute.xlu1 %403 }
 0x40e   : > { %2060 = vmatmul.mubr.msk.bf16.vlgmr.msra.gmra.mrb[4].mxu0 %vm254_vm1, %v404_v35 }
 0x40f   : > { %2065 = vmatprep.mubr.msk.bf16.mxu0 %vm2526_vm0, %v3584_v43 }
 0x4e1   : > { %v2994_v63 = vpop.f32.mrb[4].mxu0 }
 0x4e2   : > { %3587 = vst [vmem:[#allocation68_spill] sm:$0xff] %v2994_v63  ;;  %v461_v42 = vcombine.high %v2994_v63, %v2994_v63  ;;  %v468_v36 = vrot.slane %v2994_v63, %v467_v62  ;;  %v2061_v0 = vpop.f32.mrb[5].mxu0 }
 0x4e3   : > { %v457_v35 = vpop.f32.mrb[6].mxu0 }
 0x4e4   : > { %v475_v44 = vrot.slane %v461_v42, %v467_v62  ;;  %v476_v38 = vcombine.high %v468_v36, %v468_v36  ;;  %v484_v39 = vrot.slane %v468_v36, %v467_v62  ;;  %v2062_v45 = vpop.f32.mrb[7].mxu0 }
 0x4e6   : > { %v477_v41 = vcombine.high %v475_v44, %v475_v44  ;;  %v491_v46 = vrot.slane %v475_v44, %v467_v62  ;;  %v498_v47 = vrot.slane %v476_v38, %v467_v62  ;;  %v506_v40 = vcombine.high %v484_v39, %v484_v39 }
 0x4e7   : > { %v513_v48 = vrot.slane %v484_v39, %v3000_v60 }
 0x4e8   : > { %v508_v49 = vcombine.high %v498_v47, %v498_v47  ;;  %v521_v50 = vrot.slane %v506_v40, %v3000_v60  ;;  %v517_v52 = vrot.slane %v498_v47, %v3000_v60  ;;  %v529_v42 = vrot.slane %v491_v46, %v3000_v60 }
 0x4e9   : > { %v551_v51 = vadd.f32 %v513_v48, %v3588_v3  ;;  %v550_v0 = vadd.f32 %v513_v48, %v3589_v2  ;;  %v505_v35 = vrot.slane %v477_v41, %v467_v62  ;;  %v507_v48 = vcombine.high %v491_v46, %v491_v46 }
 0x4ea   : > { %v554_v45 = vadd.f32 %v521_v50, %v3590_v6  ;;  %v552_v44 = vadd.f32 %v517_v52, %v3591_v4  ;;  %v553_v36 = vadd.f32 %v517_v52, %v3592_v5  ;;  %v525_v38 = vrot.slane %v508_v49, %v3000_v60 }
 0x4eb   : > { %2176 = vtanh.f32 %v551_v51  ;;  %v558_v39 = vadd.f32 %v529_v42, %v3593_v10  ;;  %v533_v62 = vrot.slane %v505_v35, %v3000_v60  ;;  %v555_v51 = vadd.f32 %v521_v50, %v3595_v7 }
 0x4ec   : > { %2178 = vtanh.f32 %v550_v0  ;;  %v556_v47 = vadd.f32 %v525_v38, %v3594_v8  ;;  %v537_v52 = vrot.slane %v507_v48, %v3000_v60  ;;  %v509_v49 = vcombine.high %v505_v35, %v505_v35 }
 0x4ed   : > { %2180 = vtanh.f32 %v554_v45  ;;  %v560_v41 = vadd.f32 %v533_v62, %v3596_v12  ;;  %v559_v40 = vadd.f32 %v529_v42, %v3597_v11  ;;  %v557_v42 = vadd.f32 %v525_v38, %v3599_v9 }
 0x4ee   : > { %2182 = vtanh.f32 %v552_v44  ;;  %v541_v50 = vrot.slane %v509_v49, %v3000_v60 }
 0x4ef   : > { %2184 = vtanh.f32 %v553_v36 }
 0x4f0   : > { %2186 = vtanh.f32 %v558_v39  ;;  %v562_v39 = vadd.f32 %v537_v52, %v3598_v14 }
 0x4f1   : > { %2188 = vtanh.f32 %v556_v47 }
 0x4f2   : > { %2190 = vtanh.f32 %v555_v51 }
 0x4f3   : > { %2192 = vtanh.f32 %v560_v41  ;;  %v564_v41 = vadd.f32 %v541_v50, %v3600_v16 }
 0x4f4   : > { %2194 = vtanh.f32 %v559_v40  ;;  %v561_v40 = vadd.f32 %v533_v62, %v3601_v13 }
 0x4f5   : > { %v2177_v0 = vpop.eup %2176  ;;  %2196 = vtanh.f32 %v562_v39 }
 0x4f6   : > { %v2179_v45 = vpop.eup %2178  ;;  %v589_v46 = vmul.f32 %v2177_v0, %v3565_v54  ;;  %2198 = vtanh.f32 %v557_v42 }
 0x4f7   : > { %v2181_v44 = vpop.eup %2180  ;;  %v588_v36 = vmul.f32 %v2179_v45, %v3565_v54  ;;  %2200 = vtanh.f32 %v564_v41  ;;  %v565_v41 = vadd.f32 %v541_v50, %v3603_v17 }
 0x4f8   : > { %v2183_v47 = vpop.eup %2182  ;;  %v607_v2 = vsel %vm254_vm1, %v589_v46, 0.0  ;;  %v592_v35 = vmul.f32 %v2181_v44, %v3565_v54  ;;  %2202 = vtanh.f32 %v561_v40 }
 0x4f9   : > { %v2185_v48 = vpop.eup %2184  ;;  %608 = vadd.xlane.f32.xlu1 %v607_v2  ;;  %v604_v51 = vsel %vm254_vm1, %v588_v36, 0.0  ;;  %v590_v0 = vmul.f32 %v2183_v47, %v3565_v54 }
 0x4fa   : > { %v2187_v45 = vpop.eup %2186  ;;  %605 = vadd.xlane.f32.xlu0 %v604_v51  ;;  %v616_v49 = vsel %vm254_vm1, %v592_v35, 0.0  ;;  %v591_v38 = vmul.f32 %v2185_v48, %v3565_v54  ;;  %v563_v35 = vadd.f32 %v537_v52, %v3602_v15 }
 0x4fb   : > { %v596_v46 = vmul.f32 %v2187_v45, %v3565_v54  ;;  %v2189_v44 = vpop.eup %2188  ;;  %v610_v2 = vsel %vm254_vm1, %v590_v0, 0.0 }
 0x4fc   : > { %v2191_v36 = vpop.eup %2190  ;;  %v594_v47 = vmul.f32 %v2189_v44, %v3565_v54  ;;  %v613_v42 = vsel %vm254_vm1, %v591_v38, 0.0  ;;  %2204 = vtanh.f32 %v563_v35 }
 0x4fd   : > { %617 = vadd.xlane.f32.xlu1 %v616_v49  ;;  %v628_v39 = vsel %vm254_vm1, %v596_v46, 0.0  ;;  %v2193_v51 = vpop.eup %2192  ;;  %v593_v62 = vmul.f32 %v2191_v36, %v3565_v54  ;;  %2206 = vtanh.f32 %v565_v41 }
 0x4fe   : > { %611 = vadd.xlane.f32.xlu0 %v610_v2  ;;  %v2195_v45 = vpop.eup %2194  ;;  %v622_v48 = vsel %vm254_vm1, %v594_v47, 0.0  ;;  %v598_v0 = vmul.f32 %v2193_v51, %v3565_v54 }
 0x4ff   : > { %v2197_v49 = vpop.eup %2196  ;;  %v619_v46 = vsel %vm254_vm1, %v593_v62, 0.0  ;;  %v597_v52 = vmul.f32 %v2195_v45, %v3565_v54 }
 0x500   : > { %v2199_v40 = vpop.eup %2198  ;;  %v634_v44 = vsel %vm254_vm1, %v598_v0, 0.0  ;;  %v600_v2 = vmul.f32 %v2197_v49, %v3565_v54 }
 0x501   : > { %629 = vadd.xlane.f32.xlu1 %v628_v39  ;;  %v2201_v38 = vpop.eup %2200  ;;  %v631_v36 = vsel %vm254_vm1, %v597_v52, 0.0  ;;  %v595_v39 = vmul.f32 %v2199_v40, %v3565_v54 }
 0x502   : > { %614 = vadd.xlane.f32.xlu0 %v613_v42  ;;  %v2203_v50 = vpop.eup %2202  ;;  %v640_v47 = vsel %vm254_vm1, %v600_v2, 0.0  ;;  %v602_v35 = vmul.f32 %v2201_v38, %v3565_v54 }
 0x503   : > { %v625_v51 = vsel %vm254_vm1, %v595_v39, 0.0  ;;  %v599_v42 = vmul.f32 %v2203_v50, %v3565_v54 }
 0x504   : > { %v646_v45 = vsel %vm254_vm1, %v602_v35, 0.0 }
 0x505   : > { %623 = vadd.xlane.f32.xlu1 %v622_v48  ;;  %v637_v48 = vsel %vm254_vm1, %v599_v42, 0.0 }
 0x506   : > { %620 = vadd.xlane.f32.xlu0 %v619_v46  ;;  %v2205_v62 = vpop.eup %2204 }
 0x507   : > { %v601_v0 = vmul.f32 %v2205_v62, %v3565_v54  ;;  %v2207_v41 = vpop.eup %2206 }
 0x508   : > { %v603_v46 = vmul.f32 %v2207_v41, %v3565_v54 }
 0x509   : > { %635 = vadd.xlane.f32.xlu1 %v634_v44  ;;  %v643_v49 = vsel %vm254_vm1, %v601_v0, 0.0 }
 0x50a   : > { %632 = vadd.xlane.f32.xlu0 %v631_v36  ;;  %v649_v52 = vsel %vm254_vm1, %v603_v46, 0.0 }
 0x50d   : > { %641 = vadd.xlane.f32.xlu1 %v640_v47 }
 0x50e   : > { %626 = vadd.xlane.f32.xlu0 %v625_v51 }
 0x511   : > { %647 = vadd.xlane.f32.xlu1 %v646_v45 }
 0x512   : > { %638 = vadd.xlane.f32.xlu0 %v637_v48 }
 0x516   : > { %644 = vadd.xlane.f32.xlu0 %v643_v49 }
 0x51a   : > { %650 = vadd.xlane.f32.xlu0 %v649_v52 }
 0x522   : > { %658 = vbcast.lane.b32.xlu1 %v3566_v34, 256 }
 0x530   : > { %662 = vbcast.lane.b32.xlu0 %v3566_v34, 264 }
 0x586   : > { %v609_v40 = vpop.xlane.xlu1 %608 }
 0x587   : > { %v606_v44 = vpop.xlane.xlu0 %605 }
 0x58a   : > { %v618_v2 = vpop.xlane.xlu1 %617 }
 0x58b   : > { %v612_v38 = vpop.xlane.xlu0 %611 }
 0x58e   : > { %v630_v36 = vpop.xlane.xlu1 %629 }
 0x58f   : > { %v615_v39 = vpop.xlane.xlu0 %614 }
 0x592   : > { %v624_v50 = vpop.xlane.xlu1 %623 }
 0x593   : > { %v621_v47 = vpop.xlane.xlu0 %620 }
 0x596   : > { %v636_v35 = vpop.xlane.xlu1 %635 }
 0x597   : > { %v633_v51 = vpop.xlane.xlu0 %632 }
 0x59a   : > { %v642_v42 = vpop.xlane.xlu1 %641 }
 0x59b   : > { %v627_v62 = vpop.xlane.xlu0 %626 }
 0x59e   : > { %v648_v45 = vpop.xlane.xlu1 %647 }
 0x59f   : > { %v639_v48 = vpop.xlane.xlu0 %638 }
 0x5a2   : > { %v659_v0 = vpop.permute.xlu1 %658 }
 0x5a3   : > { %v645_v41 = vpop.xlane.xlu0 %644  ;;  %v3060_v49 = vadd.f32 %v659_v0, %v612_v38  ;;  %v3062_v46 = vadd.f32 %v659_v0, %v606_v44  ;;  %v3066_v3 = vadd.f32 %v659_v0, %v618_v2  ;;  %v3069_v5 = vadd.f32 %v659_v0, %v630_v36 }
 0x5a4   : > { %v3075_v44 = vadd.f32 %v659_v0, %v624_v50  ;;  %v3081_v2 = vadd.f32 %v659_v0, %v636_v35 }
 0x5a5   : > { %705 = vperm.xlu0 %2166, %v3060_v49   ;;  %699 = vperm.xlu1 %2167, %v3062_v46  }
 0x5a7   : > { %v651_v52 = vpop.xlane.xlu0 %650 }
 0x5a9   : > { %711 = vperm.xlu0 %2166, %v3066_v3  }
 0x5ab   : > { %v663_v4 = vpop.permute.xlu0 %662 }
 0x5ac   : > { %v3071_v6 = vadd.f32 %v663_v4, %v609_v40  ;;  %v3077_v38 = vadd.f32 %v663_v4, %v615_v39  ;;  %v3083_v7 = vadd.f32 %v663_v4, %v621_v47  ;;  %v3087_v40 = vadd.f32 %v659_v0, %v642_v42 }
 0x5ad   : > { %723 = vperm.xlu0 %2166, %v3069_v5   ;;  %v3089_v36 = vadd.f32 %v663_v4, %v633_v51  ;;  %v3093_v39 = vadd.f32 %v659_v0, %v648_v45  ;;  %v3095_v50 = vadd.f32 %v663_v4, %v627_v62  ;;  %v3099_v47 = vadd.f32 %v663_v4, %v639_v48 }
 0x5ae   : > { %702 = vperm.xlu1 %2167, %v3071_v6   ;;  %v3102_v35 = vadd.f32 %v663_v4, %v645_v41  ;;  %v3105_v51 = vadd.f32 %v663_v4, %v651_v52  ;;  %v750_v48 = vadd.s32 4294967288, %v3564_v1  ;;  %v3111_v41 = vsub.s32 %v3564_v1, %v2991_v61 }
 0x5b0   : > { %v3114_v4 = vsub.s32 %v750_v48, %v2991_v61 }
 0x5b1   : > { %717 = vperm.xlu0 %2166, %v3075_v44  }
 0x5b2   : > { %708 = vperm.xlu1 %2167, %v3077_v38  }
 0x5b5   : > { %729 = vperm.xlu0 %2166, %v3081_v2  }
 0x5b6   : > { %714 = vperm.xlu1 %2167, %v3083_v7  }
 0x5b9   : > { %735 = vperm.xlu0 %2166, %v3087_v40  }
 0x5ba   : > { %726 = vperm.xlu1 %2167, %v3089_v36  }
 0x5bd   : > { %741 = vperm.xlu0 %2166, %v3093_v39  }
 0x5be   : > { %720 = vperm.xlu1 %2167, %v3095_v50  }
 0x5c2   : > { %732 = vperm.xlu1 %2167, %v3099_v47  }
 0x5c6   : > { %738 = vperm.xlu1 %2167, %v3102_v35  }
 0x5ca   : > { %744 = vperm.xlu1 %2167, %v3105_v51  }
 0x624   : > { %v706_v42 = vpop.permute.xlu0 %705  ;;  %v700_v45 = vpop.permute.xlu1 %699 }
 0x625   : > { %v760_v16 = vrot.slane %v706_v42, %v3111_v41  ;;  %v749_v1 = vrot.slane %v700_v45, %v3111_v41 }
 0x628   : > { %v712_v62 = vpop.permute.xlu0 %711 }
 0x629   : > { %v769_v53 = vrot.slane %v712_v62, %v3111_v41 }
 0x62c   : > { %v724_v8 = vpop.permute.xlu0 %723 }
 0x62d   : > { %v703_v0 = vpop.permute.xlu1 %702 }
 0x62e   : > { %v754_v17 = vrot.slane %v703_v0, %v3114_v4 }
 0x630   : > { %v718_v10 = vpop.permute.xlu0 %717  ;;  %v756_v42 = vsel %vm755_vm4, %v754_v17, %v749_v1 }
 0x631   : > { %v709_v9 = vpop.permute.xlu1 %708  ;;  %v778_v48 = vrot.slane %v718_v10, %v3111_v41 }
 0x632   : > { %v764_v14 = vrot.slane %v709_v9, %v3114_v4 }
 0x634   : > { %v730_v13 = vpop.permute.xlu0 %729  ;;  %v765_v9 = vsel %vm755_vm4, %v764_v14, %v760_v16 }
 0x635   : > { %v715_v11 = vpop.permute.xlu1 %714  ;;  %v796_v10 = vrot.slane %v730_v13, %v3111_v41 }
 0x636   : > { %v773_v15 = vrot.slane %v715_v11, %v3114_v4 }
 0x638   : > { %v736_v54 = vpop.permute.xlu0 %735  ;;  %v774_v11 = vsel %vm755_vm4, %v773_v15, %v769_v53  ;;  %v787_v15 = vrot.slane %v724_v8, %v3111_v41 }
 0x639   : > { %v727_v12 = vpop.permute.xlu1 %726  ;;  %v805_v1 = vrot.slane %v736_v54, %v3111_v41 }
 0x63a   : > { %v791_v63 = vrot.slane %v727_v12, %v3114_v4 }
 0x63c   : > { %v742_v16 = vpop.permute.xlu0 %741  ;;  %v792_v12 = vsel %vm755_vm4, %v791_v63, %v787_v15 }
 0x63d   : > { %v721_v52 = vpop.permute.xlu1 %720 }
 0x63e   : > { %v782_v34 = vrot.slane %v721_v52, %v3114_v4  ;;  %v821_v52 = vsel %vm820_vm5, %v765_v9, %v756_v42  ;;  %v3511_v42 = vsub.s32 1, %v2991_v61 }
 0x63f   : > { %v823_v58 = vsel %vm822_vm6, %v774_v11, %v821_v52 }
 0x640   : > { %v783_v0 = vsel %vm755_vm4, %v782_v34, %v778_v48 }
 0x641   : > { %v733_v37 = vpop.permute.xlu1 %732  ;;  %v825_v17 = vsel %vm824_vm7, %v783_v0, %v823_v58 }
 0x642   : > { %v800_v62 = vrot.slane %v733_v37, %v3114_v4  ;;  %v814_v37 = vrot.slane %v742_v16, %v3111_v41  ;;  %v827_v8 = vsel %vm826_vm8, %v792_v12, %v825_v17  ;;  %v3512_v16 = vsub.s32 7, %v2991_v61 }
 0x644   : > { %v801_v34 = vsel %vm755_vm4, %v800_v62, %v796_v10  ;;  %v3513_v62 = vsub.s32 4, %v2991_v61 }
 0x645   : > { %v739_v45 = vpop.permute.xlu1 %738  ;;  %v829_v54 = vsel %vm828_vm9, %v801_v34, %v827_v8  ;;  %v3510_v34 = vsub.s32 2, %v2991_v61 }
 0x646   : > { %v809_v14 = vrot.slane %v739_v45, %v3114_v4 }
 0x648   : > { %v810_v53 = vsel %vm755_vm4, %v809_v14, %v805_v1 }
 0x649   : > { %v745_v13 = vpop.permute.xlu1 %744  ;;  %v831_v9 = vsel %vm830_vm10, %v810_v53, %v829_v54 }
 0x64a   : > { %v818_v48 = vrot.slane %v745_v13, %v3114_v4 }
 0x64c   : > { %v819_v58 = vsel %vm755_vm4, %v818_v48, %v814_v37 }
 0x64d   : > { %v833_v63 = vsel %vm832_vm11, %v819_v58, %v831_v9 }
 0x64e   : > { %v836_v11 = vsel %vm835_vm12, %v833_v63, -inf }
 0x64f   : > { %837 = vmax.xlane.f32.xlu0 %v836_v11 }
 0x6dc   : > { %v3149_v0 = vpop.xlane.xlu0 %837 }
 0x6dd   : > { %v843_v52 = vrot.slane %v3149_v0, %v3000_v60  ;;  %v847_v10 = vrot.slane %v3149_v0, %v3511_v42  ;;  %v859_v14 = vrot.slane %v3149_v0, %v3513_v62  ;;  %v3169_v53 = vrot.slane %v3149_v0, %v3512_v16 }
 0x6df   : > { %v880_v45 = vsub.f32 %v3062_v46, %v843_v52  ;;  %v881_v15 = vsub.f32 %v3071_v6, %v843_v52  ;;  %v882_v17 = vsub.f32 %v3060_v49, %v847_v10  ;;  %v888_v12 = vsub.f32 %v3069_v5, %v859_v14 }
 0x6e0   : > { %v851_v6 = vrot.slane %v3149_v0, %v3510_v34  ;;  %v883_v37 = vsub.f32 %v3077_v38, %v847_v10  ;;  %v895_v48 = vsub.f32 %v3105_v51, %v3169_v53  ;;  %v3509_v5 = vsub.s32 3, %v2991_v61 }
 0x6e1   : > { %v896_v1 = vmul.f32 1.442695, %v880_v45  ;;  %v898_v46 = vmul.f32 1.442695, %v881_v15  ;;  %v900_v13 = vmul.f32 1.442695, %v882_v17 }
 0x6e2   : > { %v912_v49 = vmul.f32 1.442695, %v888_v12  ;;  %v884_v8 = vsub.f32 %v3066_v3, %v851_v6  ;;  %v902_v54 = vmul.f32 1.442695, %v883_v37  ;;  %v926_v9 = vmul.f32 1.442695, %v895_v48 }
 0x6e3   : > { %2208 = vpow2.f32 %v896_v1  ;;  %v855_v38 = vrot.slane %v3149_v0, %v3509_v5  ;;  %v885_v63 = vsub.f32 %v3083_v7, %v851_v6  ;;  %v3508_v7 = vsub.s32 5, %v2991_v61 }
 0x6e4   : > { %2210 = vpow2.f32 %v898_v46  ;;  %v904_v51 = vmul.f32 1.442695, %v884_v8  ;;  %v889_v12 = vsub.f32 %v3089_v36, %v859_v14 }
 0x6e5   : > { %2212 = vpow2.f32 %v900_v13  ;;  %v886_v3 = vsub.f32 %v3075_v44, %v855_v38  ;;  %v906_v52 = vmul.f32 1.442695, %v885_v63  ;;  %v887_v15 = vsub.f32 %v3095_v50, %v855_v38 }
 0x6e6   : > { %2214 = vpow2.f32 %v912_v49  ;;  %v863_v44 = vrot.slane %v3149_v0, %v3508_v7  ;;  %v3507_v50 = vsub.s32 6, %v2991_v61  ;;  %v914_v49 = vmul.f32 1.442695, %v889_v12 }
 0x6e7   : > { %2216 = vpow2.f32 %v902_v54  ;;  %v908_v1 = vmul.f32 1.442695, %v886_v3  ;;  %v910_v46 = vmul.f32 1.442695, %v887_v15 }
 0x6e8   : > { %2218 = vpow2.f32 %v926_v9  ;;  %v890_v37 = vsub.f32 %v3081_v2, %v863_v44  ;;  %v867_v36 = vrot.slane %v3149_v0, %v3507_v50  ;;  %v891_v14 = vsub.f32 %v3099_v47, %v863_v44 }
 0x6e9   : > { %2220 = vpow2.f32 %v904_v51  ;;  %v894_v47 = vsub.f32 %v3093_v39, %v3169_v53 }
 0x6ea   : > { %2222 = vpow2.f32 %v906_v52  ;;  %v916_v8 = vmul.f32 1.442695, %v890_v37  ;;  %v892_v2 = vsub.f32 %v3087_v40, %v867_v36  ;;  %v918_v9 = vmul.f32 1.442695, %v891_v14 }
 0x6eb   : > { %2224 = vpow2.f32 %v908_v1  ;;  %v893_v63 = vsub.f32 %v3102_v35, %v867_v36  ;;  %v924_v52 = vmul.f32 1.442695, %v894_v47 }
 0x6ec   : > { %2226 = vpow2.f32 %v910_v46  ;;  %v920_v0 = vmul.f32 1.442695, %v892_v2 }
 0x6ed   : > { %v3179_v58 = vpop.eup %2208  ;;  %2228 = vpow2.f32 %v914_v49  ;;  %v922_v3 = vmul.f32 1.442695, %v893_v63 }
 0x6ee   : > { %945 = vperm.xlu1 %2167, %v3179_v58   ;;  %v3186_v11 = vpop.eup %2210  ;;  %2230 = vpow2.f32 %v916_v8 }
 0x6ef   : > { %v3190_v45 = vpop.eup %2212  ;;  %2232 = vpow2.f32 %v918_v9 }
 0x6f0   : > { %v3192_v10 = vpop.eup %2214  ;;  %2234 = vpow2.f32 %v920_v0 }
 0x6f1   : > { %969 = vperm.xlu0 %2166, %v3192_v10   ;;  %v3198_v17 = vpop.eup %2216  ;;  %2236 = vpow2.f32 %v922_v3 }
 0x6f2   : > { %948 = vperm.xlu1 %2167, %v3186_v11   ;;  %v3205_v13 = vpop.eup %2218  ;;  %2238 = vpow2.f32 %v924_v52 }
 0x6f3   : > { %v3207_v6 = vpop.eup %2220 }
 0x6f4   : > { %v3213_v48 = vpop.eup %2222 }
 0x6f5   : > { %990 = vperm.xlu0 %2166, %v3205_v13   ;;  %v3220_v54 = vpop.eup %2224 }
 0x6f6   : > { %951 = vperm.xlu1 %2167, %v3190_v45   ;;  %v3224_v38 = vpop.eup %2226 }
 0x6f7   : > { %v3228_v51 = vpop.eup %2228 }
 0x6f8   : > { %v3233_v40 = vpop.eup %2230 }
 0x6f9   : > { %v3236_v15 = vpop.eup %2232 }
 0x6fa   : > { %954 = vperm.xlu1 %2167, %v3198_v17   ;;  %v3239_v35 = vpop.eup %2234 }
 0x6fb   : > { %v3242_v1 = vpop.eup %2236 }
 0x6fc   : > { %v2239_v39 = vpop.eup %2238 }
 0x6fe   : > { %957 = vperm.xlu1 %2167, %v3207_v6  }
 0x702   : > { %960 = vperm.xlu1 %2167, %v3213_v48  }
 0x706   : > { %963 = vperm.xlu1 %2167, %v3220_v54  }
 0x70a   : > { %966 = vperm.xlu1 %2167, %v3224_v38  }
 0x70e   : > { %972 = vperm.xlu1 %2167, %v3228_v51  }
 0x712   : > { %975 = vperm.xlu1 %2167, %v3233_v40  }
 0x716   : > { %978 = vperm.xlu1 %2167, %v3236_v15  }
 0x71a   : > { %981 = vperm.xlu1 %2167, %v3239_v35  }
 0x71e   : > { %984 = vperm.xlu1 %2167, %v3242_v1  }
 0x722   : > { %987 = vperm.xlu1 %2167, %v2239_v39  }
 0x76d   : > { %v946_v53 = vpop.permute.xlu1 %945 }
 0x76e   : > { %v995_v42 = vrot.slane %v946_v53, %v3111_v41 }
 0x770   : > { %v970_v0 = vpop.permute.xlu0 %969 }
 0x771   : > { %v949_v44 = vpop.permute.xlu1 %948 }
 0x772   : > { %v999_v52 = vrot.slane %v949_v44, %v3114_v4 }
 0x774   : > { %v991_v53 = vpop.permute.xlu0 %990 }
 0x775   : > { %v952_v12 = vpop.permute.xlu1 %951 }
 0x776   : > { %v1004_v50 = vrot.slane %v952_v12, %v3111_v41  ;;  %v1000_v12 = vsel %vm755_vm4, %v999_v52, %v995_v42 }
 0x779   : > { %v955_v46 = vpop.permute.xlu1 %954 }
 0x77a   : > { %v1008_v63 = vrot.slane %v955_v46, %v3114_v4 }
 0x77c   : > { %v1009_v16 = vsel %vm755_vm4, %v1008_v63, %v1004_v50 }
 0x77d   : > { %v958_v37 = vpop.permute.xlu1 %957  ;;  %v1064_v50 = vsel %vm820_vm5, %v1009_v16, %v1000_v12 }
 0x77e   : > { %v1013_v5 = vrot.slane %v958_v37, %v3111_v41 }
 0x781   : > { %v961_v49 = vpop.permute.xlu1 %960 }
 0x782   : > { %v1017_v47 = vrot.slane %v961_v49, %v3114_v4  ;;  %v1031_v49 = vrot.slane %v970_v0, %v3111_v41 }
 0x784   : > { %v1018_v44 = vsel %vm755_vm4, %v1017_v47, %v1013_v5 }
 0x785   : > { %v964_v36 = vpop.permute.xlu1 %963  ;;  %v1065_v63 = vsel %vm822_vm6, %v1018_v44, %v1064_v50  ;;  %v3604_v44 = vsub.s32 4, %v2991_v61 }
 0x786   : > { %v1022_v46 = vrot.slane %v964_v36, %v3111_v41 }
 0x789   : > { %v967_v14 = vpop.permute.xlu1 %966 }
 0x78a   : > { %v1026_v7 = vrot.slane %v967_v14, %v3114_v4 }
 0x78c   : > { %v1027_v14 = vsel %vm755_vm4, %v1026_v7, %v1022_v46 }
 0x78d   : > { %v973_v8 = vpop.permute.xlu1 %972  ;;  %v1066_v0 = vsel %vm824_vm7, %v1027_v14, %v1065_v63 }
 0x78e   : > { %v1035_v34 = vrot.slane %v973_v8, %v3114_v4 }
 0x790   : > { %v1036_v36 = vsel %vm755_vm4, %v1035_v34, %v1031_v49 }
 0x791   : > { %v976_v2 = vpop.permute.xlu1 %975 }
 0x792   : > { %v1040_v37 = vrot.slane %v976_v2, %v3111_v41  ;;  %v1062_v2 = vrot.slane %v991_v53, %v3114_v4  ;;  %v3606_v53 = vsub.s32 1, %v2991_v61 }
 0x795   : > { %v979_v9 = vpop.permute.xlu1 %978 }
 0x796   : > { %v1044_v62 = vrot.slane %v979_v9, %v3114_v4 }
 0x798   : > { %v1045_v5 = vsel %vm755_vm4, %v1044_v62, %v1040_v37  ;;  %v3605_v37 = vsub.s32 7, %v2991_v61 }
 0x799   : > { %v982_v3 = vpop.permute.xlu1 %981 }
 0x79a   : > { %v1049_v9 = vrot.slane %v982_v3, %v3111_v41 }
 0x79d   : > { %v985_v59 = vpop.permute.xlu1 %984 }
 0x79e   : > { %v1053_v8 = vrot.slane %v985_v59, %v3114_v4  ;;  %v1067_v59 = vsel %vm826_vm8, %v1036_v36, %v1066_v0 }
 0x79f   : > { %v1068_v16 = vsel %vm828_vm9, %v1045_v5, %v1067_v59 }
 0x7a0   : > { %v1054_v42 = vsel %vm755_vm4, %v1053_v8, %v1049_v9 }
 0x7a1   : > { %v988_v7 = vpop.permute.xlu1 %987  ;;  %v1069_v3 = vsel %vm830_vm10, %v1054_v42, %v1068_v16 }
 0x7a2   : > { %v1058_v47 = vrot.slane %v988_v7, %v3111_v41 }
 0x7a4   : > { %v1063_v34 = vsel %vm755_vm4, %v1062_v2, %v1058_v47 }
 0x7a5   : > { %v1070_v52 = vsel %vm832_vm11, %v1063_v34, %v1069_v3 }
 0x7a6   : > { %v1072_v62 = vsel %vm835_vm12, %v1070_v52, 0.0  ;;  %v1981_v52 = vcombine.low %v2788_v18, %v2790_v19 }
 0x7a7   : > { %1073 = vadd.xlane.f32.xlu1 %v1072_v62 }
 0x7a8   : > { %2064 = vmatpush3.bf16.msra.mxu0 %v1981_v52 }
 0x7a9   : > { %2075 = vmatprep.subr.bf16.mxu0 %v3584_v43 }
 0x834   : > { %v1074_v46 = vpop.xlane.xlu1 %1073 }
 0x835   : > { %2240 = vrcp.f32 %v1074_v46  ;;  %v3608_v46 = vsub.s32 3, %v2991_v61 }
 0x83f   : > { %v2241_v49 = vpop.eup %2240 }
 0x840   : > { %v1096_v12 = vrot.slane %v2241_v49, %v3604_v44  ;;  %v1080_v14 = vrot.slane %v2241_v49, %v3000_v60  ;;  %v1108_v8 = vrot.slane %v2241_v49, %v3605_v37  ;;  %v1084_v50 = vrot.slane %v2241_v49, %v3606_v53 }
 0x841   : > { %v1092_v44 = vrot.slane %v2241_v49, %v3608_v46 }
 0x842   : > { %v1125_v36 = vmul.f32 %v3192_v10, %v1096_v12  ;;  %v1126_v9 = vmul.f32 %v3228_v51, %v1096_v12  ;;  %v1117_v63 = vmul.f32 %v3179_v58, %v1080_v14  ;;  %v1118_v5 = vmul.f32 %v3186_v11, %v1080_v14 }
 0x843   : > { %v1131_v0 = vmul.f32 %v2239_v39, %v1108_v8  ;;  %v1132_v42 = vmul.f32 %v3205_v13, %v1108_v8  ;;  %v1119_v60 = vmul.f32 %v3190_v45, %v1084_v50  ;;  %v1120_v34 = vmul.f32 %v3198_v17, %v1084_v50 }
 0x844   : > { %v1137_v7 = vpack.c.bf16 %v1126_v9, %v1125_v36  ;;  %v1133_v2 = vpack.c.bf16 %v1118_v5, %v1117_v63  ;;  %v3607_v58 = vsub.s32 2, %v2991_v61  ;;  %v1983_v14 = vcombine.low %v2792_v20, %v2794_v21 }
 0x845   : > { %v1140_v16 = vpack.c.bf16 %v1132_v42, %v1131_v0  ;;  %v1134_v3 = vpack.c.bf16 %v1120_v34, %v1119_v60  ;;  %v3609_v50 = vsub.s32 5, %v2991_v61  ;;  %v3610_v0 = vsub.s32 6, %v2991_v61 }
 0x846   : > { %v1415_v59 = vunpack.c.h.b16 %v1137_v7  ;;  %v1142_v47 = vunpack.c.l.b16 %v1133_v2  ;;  %v1143_v51 = vunpack.c.h.b16 %v1133_v2  ;;  %v1088_v11 = vrot.slane %v2241_v49, %v3607_v58  ;;  %2070 = vmatpush3.bf16.msra.mxu1 %v1983_v14 }
 0x847   : > { %v1619_v10 = vunpack.c.h.b16 %v1140_v16  ;;  %v1210_v13 = vunpack.c.l.b16 %v1134_v3  ;;  %v1211_v17 = vunpack.c.h.b16 %v1134_v3  ;;  %2081 = vmatprep.subr.bf16.mxu1 %v3584_v43  ;;  %v1100_v36 = vrot.slane %v2241_v49, %v3609_v50 }
 0x848   : > { %1420 = vperm.xlu1 %2167, %v1415_v59   ;;  %1145 = vperm.xlu0 %2166, %v1142_v47   ;;  %v1121_v39 = vmul.f32 %v3207_v6, %v1088_v11  ;;  %v1122_v45 = vmul.f32 %v3213_v48, %v1088_v11  ;;  %v1123_v6 = vmul.f32 %v3220_v54, %v1092_v44  ;;  %v1414_v63 = vunpack.c.l.b16 %v1137_v7 }
 0x849   : > { %v1124_v48 = vmul.f32 %v3224_v38, %v1092_v44  ;;  %v1127_v54 = vmul.f32 %v3233_v40, %v1100_v36  ;;  %v1128_v38 = vmul.f32 %v3236_v15, %v1100_v36  ;;  %v1104_v42 = vrot.slane %v2241_v49, %v3610_v0 }
 0x84a   : > { %v1135_v62 = vpack.c.bf16 %v1122_v45, %v1121_v39  ;;  %v1618_v15 = vunpack.c.l.b16 %v1140_v16  ;;  %v1987_v45 = vcombine.low %v2800_v24, %v2802_v25 }
 0x84b   : > { %v1136_v8 = vpack.c.bf16 %v1124_v48, %v1123_v6  ;;  %v1138_v5 = vpack.c.bf16 %v1128_v38, %v1127_v54  ;;  %v1129_v60 = vmul.f32 %v3239_v35, %v1104_v42  ;;  %v1130_v59 = vmul.f32 %v3242_v1, %v1104_v42 }
 0x84c   : > { %1624 = vperm.xlu1 %2167, %v1619_v10   ;;  %1148 = vperm.xlu0 %2166, %v1143_v51   ;;  %v1278_v12 = vunpack.c.l.b16 %v1135_v62  ;;  %v1279_v37 = vunpack.c.h.b16 %v1135_v62  ;;  %v1985_v1 = vcombine.low %v2796_v22, %v2798_v23  ;;  %v1989_v6 = vcombine.low %v2804_v26, %v2806_v27 }
 0x84d   : > { %v1346_v53 = vunpack.c.l.b16 %v1136_v8  ;;  %v1347_v9 = vunpack.c.h.b16 %v1136_v8  ;;  %v1482_v2 = vunpack.c.l.b16 %v1138_v5  ;;  %v1483_v47 = vunpack.c.h.b16 %v1138_v5 }
 0x84e   : > { %v1139_v34 = vpack.c.bf16 %v1130_v59, %v1129_v60  ;;  %v1993_v42 = vcombine.low %v2812_v30, %v2814_v31 }
 0x850   : > { %1213 = vperm.xlu0 %2166, %v1210_v13   ;;  %1716 = vrot.lane.b32.xlu1 %v2913_v55, %s2527_s13  ;;  %v1550_v10 = vunpack.c.l.b16 %v1139_v34  ;;  %v1551_v40 = vunpack.c.h.b16 %v1139_v34 }
 0x854   : > { %1216 = vperm.xlu0 %2166, %v1211_v17  }
 0x858   : > { %1281 = vperm.xlu0 %2166, %v1278_v12  }
 0x85c   : > { %1284 = vperm.xlu0 %2166, %v1279_v37  }
 0x860   : > { %1349 = vperm.xlu0 %2166, %v1346_v53  }
 0x864   : > { %1352 = vperm.xlu0 %2166, %v1347_v9   ;;  %v1991_v9 = vcombine.low %v2808_v28, %v2810_v29 }
 0x868   : > { %1417 = vperm.xlu0 %2166, %v1414_v63  }
 0x86c   : > { %1485 = vperm.xlu0 %2166, %v1482_v2  }
 0x870   : > { %1488 = vperm.xlu0 %2166, %v1483_v47  }
 0x874   : > { %1553 = vperm.xlu0 %2166, %v1550_v10  }
 0x878   : > { %1556 = vperm.xlu0 %2166, %v1551_v40   ;;  %v1995_v40 = vcombine.low %v2816_v32, %v2818_v33 }
 0x87c   : > { %1621 = vperm.xlu0 %2166, %v1618_v15  }
 0x8c7   : > { %v1146_v7 = vpop.permute.xlu0 %1145  ;;  %v1421_v50 = vpop.permute.xlu1 %1420 }
 0x8c8   : > { %v1153_v61 = vrot.slane %v1146_v7, %v3111_v41  ;;  %v1429_v63 = vrot.slane %v1421_v50, %v3114_v4 }
 0x8cb   : > { %v1149_v51 = vpop.permute.xlu0 %1148 }
 0x8cc   : > { %v1157_v49 = vrot.slane %v1149_v51, %v3114_v4 }
 0x8ce   : > { %v1158_v35 = vsel %vm755_vm4, %v1157_v49, %v1153_v61 }
 0x8cf   : > { %v1159_v3 = vpack.c.b16 %v1158_v35, %v1158_v35  ;;  %v1214_v58 = vpop.permute.xlu0 %1213  ;;  %v1625_v35 = vpop.permute.xlu1 %1624 }
 0x8d0   : > { %v1221_v11 = vrot.slane %v1214_v58, %v3111_v41 }
 0x8d1   : > { %2066 = vmatmul.mubr.msk.bf16.vlgmr.msra.gmra.mrb[8].mxu0 %vm835_vm12, %v1159_v3 }
 0x8d2   : > { %2076 = vmatpush3.bf16.msra.mxu0 %v1985_v1  ;;  %2077 = vmatprep.mubr.msk.bf16.mxu0 %vm2526_vm0, %v3584_v43 }
 0x8d3   : > { %v1217_v16 = vpop.permute.xlu0 %1216  ;;  %2087 = vmatprep.subr.bf16.mxu0 %v3584_v43 }
 0x8d4   : > { %v1225_v13 = vrot.slane %v1217_v16, %v3114_v4  ;;  %v1633_v16 = vrot.slane %v1625_v35, %v3114_v4 }
 0x8d6   : > { %v1226_v39 = vsel %vm755_vm4, %v1225_v13, %v1221_v11 }
 0x8d7   : > { %v1227_v52 = vpack.c.b16 %v1226_v39, %v1226_v39  ;;  %v1282_v17 = vpop.permute.xlu0 %1281 }
 0x8d8   : > { %v1289_v46 = vrot.slane %v1282_v17, %v3111_v41 }
 0x8d9   : > { %2072 = vmatmul.mubr.msk.bf16.vlgmr.msra.gmra.mrb[4].mxu1 %vm835_vm12, %v1227_v52 }
 0x8da   : > { %2082 = vmatpush3.bf16.msra.mxu1 %v1987_v45  ;;  %2083 = vmatprep.mubr.msk.bf16.mxu1 %vm2526_vm0, %v3584_v43 }
 0x8db   : > { %v1285_v62 = vpop.permute.xlu0 %1284  ;;  %2093 = vmatprep.subr.bf16.mxu1 %v3584_v43 }
 0x8dc   : > { %v1293_v44 = vrot.slane %v1285_v62, %v3114_v4 }
 0x8de   : > { %v1294_v12 = vsel %vm755_vm4, %v1293_v44, %v1289_v46 }
 0x8df   : > { %v1295_v48 = vpack.c.b16 %v1294_v12, %v1294_v12  ;;  %v1350_v14 = vpop.permute.xlu0 %1349 }
 0x8e0   : > { %v1357_v8 = vrot.slane %v1350_v14, %v3111_v41 }
 0x8e1   : > { %2078 = vmatmul.mubr.msk.bf16.vlgmr.msra.gmra.mrb[12].mxu0 %vm835_vm12, %v1295_v48 }
 0x8e2   : > { %2088 = vmatpush3.bf16.msra.mxu0 %v1989_v6  ;;  %2089 = vmatprep.mubr.msk.bf16.mxu0 %vm2526_vm0, %v3584_v43 }
 0x8e3   : > { %v1353_v37 = vpop.permute.xlu0 %1352  ;;  %2099 = vmatprep.subr.bf16.mxu0 %v3584_v43 }
 0x8e4   : > { %v1361_v53 = vrot.slane %v1353_v37, %v3114_v4 }
 0x8e6   : > { %v1362_v36 = vsel %vm755_vm4, %v1361_v53, %v1357_v8 }
 0x8e7   : > { %v1363_v54 = vpack.c.b16 %v1362_v36, %v1362_v36  ;;  %v1418_v38 = vpop.permute.xlu0 %1417 }
 0x8e8   : > { %v1425_v5 = vrot.slane %v1418_v38, %v3111_v41 }
 0x8e9   : > { %2084 = vmatmul.mubr.msk.bf16.vlgmr.msra.gmra.mrb[8].mxu1 %vm835_vm12, %v1363_v54 }
 0x8ea   : > { %v1430_v0 = vsel %vm755_vm4, %v1429_v63, %v1425_v5  ;;  %2094 = vmatpush3.bf16.msra.mxu1 %v1991_v9  ;;  %2095 = vmatprep.mubr.msk.bf16.mxu1 %vm2526_vm0, %v3584_v43 }
 0x8eb   : > { %v1431_v2 = vpack.c.b16 %v1430_v0, %v1430_v0  ;;  %v1486_v60 = vpop.permute.xlu0 %1485  ;;  %2105 = vmatprep.subr.bf16.mxu1 %v3584_v43 }
 0x8ec   : > { %v1493_v47 = vrot.slane %v1486_v60, %v3111_v41 }
 0x8ed   : > { %2090 = vmatmul.mubr.msk.bf16.vlgmr.msra.gmra.mrb[16].mxu0 %vm835_vm12, %v1431_v2 }
 0x8ee   : > { %2100 = vmatpush3.bf16.msra.mxu0 %v1993_v42  ;;  %2101 = vmatprep.mubr.msk.bf16.mxu0 %vm2526_vm0, %v3584_v43 }
 0x8ef   : > { %v1489_v59 = vpop.permute.xlu0 %1488  ;;  %2111 = vmatprep.subr.bf16.mxu0 %v3584_v43 }
 0x8f0   : > { %v1497_v34 = vrot.slane %v1489_v59, %v3114_v4 }
 0x8f2   : > { %v1498_v10 = vsel %vm755_vm4, %v1497_v34, %v1493_v47 }
 0x8f3   : > { %v1499_v15 = vpack.c.b16 %v1498_v10, %v1498_v10  ;;  %v1554_v7 = vpop.permute.xlu0 %1553 }
 0x8f4   : > { %v1561_v61 = vrot.slane %v1554_v7, %v3111_v41 }
 0x8f5   : > { %2096 = vmatmul.mubr.msk.bf16.vlgmr.msra.gmra.mrb[12].mxu1 %vm835_vm12, %v1499_v15 }
 0x8f6   : > { %2106 = vmatpush3.bf16.msra.mxu1 %v1995_v40  ;;  %2107 = vmatprep.mubr.msk.bf16.mxu1 %vm2526_vm0, %v3584_v43 }
 0x8f7   : > { %v1557_v51 = vpop.permute.xlu0 %1556 }
 0x8f8   : > { %v1565_v49 = vrot.slane %v1557_v51, %v3114_v4 }
 0x8fa   : > { %v1566_v1 = vsel %vm755_vm4, %v1565_v49, %v1561_v61 }
 0x8fb   : > { %v1567_v3 = vpack.c.b16 %v1566_v1, %v1566_v1  ;;  %v1622_v58 = vpop.permute.xlu0 %1621 }
 0x8fc   : > { %v1629_v11 = vrot.slane %v1622_v58, %v3111_v41 }
 0x8fd   : > { %2102 = vmatmul.mubr.msk.bf16.vlgmr.msra.gmra.mrb[20].mxu0 %vm835_vm12, %v1567_v3 }
 0x8fe   : > { %v1634_v13 = vsel %vm755_vm4, %v1633_v16, %v1629_v11  ;;  %2115 = vmatprep.mubr.msk.bf16.mxu0 %vm2526_vm0, %v3584_v43 }
 0x8ff   : > { %v1635_v39 = vpack.c.b16 %v1634_v13, %v1634_v13 }
 0x901   : > { %2108 = vmatmul.mubr.msk.bf16.vlgmr.msra.gmra.mrb[16].mxu1 %vm835_vm12, %v1635_v39 }
 0x9a4   : > { %v1203_v45 = vpop.f32.mrb[8].mxu0 }
 0x9a5   : > { %v2067_v52 = vpop.f32.mrb[9].mxu0 }
 0x9a6   : > { %v1206_v17 = vpop.f32.mrb[10].mxu0 }
 0x9a7   : > { %v2068_v62 = vpop.f32.mrb[11].mxu0  ;;  %v1999_v17 = vcombine.low %v2915_v56, %v2917_v57 }
 0x9a8   : > { %v3611_v62 = vld [vmem:[#allocation65_spill] sm:$0xff] }
 0x9a9   : > { %2112 = vmatpush3.bf16.msra.mxu0 %v1999_v17 }
 0x9aa   : > { %2113 = vmatprep.subr.bf16.mxu0 %v3584_v43 }
 0x9ac   : > { %v1271_v46 = vpop.f32.mrb[4].mxu1 }
 0x9ad   : > { %v1693_v44 = vrot.slane %v1271_v46, 7  ;;  %v2073_v12 = vpop.f32.mrb[5].mxu1  ;;  %v3612_v46 = vld [vmem:[#allocation64_spill] sm:$0xff] }
 0x9ae   : > { %v1274_v4 = vpop.f32.mrb[6].mxu1 }
 0x9af   : > { %v1694_v41 = vsel %vm820_vm5, %v1693_v44, %v1203_v45  ;;  %v2074_v6 = vpop.f32.mrb[7].mxu1  ;;  %v2000_v44 = vcombine.low %v3612_v46, %v3611_v62  ;;  %v1717_v4 = vpop.permute.xlu1 %1716 }
 0x9b1   : > { %2114 = vmatpush3.bf16.msra.mxu0 %v2000_v44 }
 0x9b4   : > { %v1339_v48 = vpop.f32.mrb[12].mxu0 }
 0x9b5   : > { %v1695_v14 = vrot.slane %v1339_v48, 6  ;;  %v2079_v37 = vpop.f32.mrb[13].mxu0 }
 0x9b6   : > { %v1342_v8 = vpop.f32.mrb[14].mxu0 }
 0x9b7   : > { %v1696_v53 = vsel %vm822_vm6, %v1695_v14, %v1694_v41  ;;  %v2080_v50 = vpop.f32.mrb[15].mxu0  ;;  %v3613_v41 = vld [vmem:[#allocation68_spill] sm:$0xff]  ;;  %v2003_v14 = vld [vmem:[%s1822_s5] ss:$0 sm:$0xff] }
 0x9b8   : > { %1829 = vrot.lane.b32.xlu1 %v2003_v14, %s2528_s15 }
 0x9bc   : > { %v1407_v36 = vpop.f32.mrb[8].mxu1 }
 0x9bd   : > { %v1697_v9 = vrot.slane %v1407_v36, 5  ;;  %v2085_v54 = vpop.f32.mrb[9].mxu1  ;;  %v3614_v36 = vld [vmem:[#allocation66_spill] sm:$0xff] }
 0x9be   : > { %v1410_v38 = vpop.f32.mrb[10].mxu1 }
 0x9bf   : > { %v1698_v63 = vsel %vm824_vm7, %v1697_v9, %v1696_v53  ;;  %v2086_v5 = vpop.f32.mrb[11].mxu1 }
 0x9c0   : > { %v1475_v0 = vpop.f32.mrb[16].mxu0 }
 0x9c1   : > { %v1699_v42 = vrot.slane %v1475_v0, 4  ;;  %v2091_v2 = vpop.f32.mrb[17].mxu0 }
 0x9c2   : > { %v1478_v60 = vpop.f32.mrb[18].mxu0 }
 0x9c3   : > { %v1700_v59 = vsel %vm826_vm8, %v1699_v42, %v1698_v63  ;;  %v2092_v47 = vpop.f32.mrb[19].mxu0 }
 0x9c8   : > { %v1543_v34 = vpop.f32.mrb[12].mxu1 }
 0x9c9   : > { %v1701_v10 = vrot.slane %v1543_v34, 3  ;;  %v2097_v40 = vpop.f32.mrb[13].mxu1  ;;  %v3615_v34 = vld [vmem:[#allocation26_spill] sm:$0xff] }
 0x9ca   : > { %v1546_v15 = vpop.f32.mrb[14].mxu1 }
 0x9cb   : > { %v1702_v7 = vsel %vm828_vm9, %v1701_v10, %v1700_v59  ;;  %v2098_v51 = vpop.f32.mrb[15].mxu1 }
 0x9d0   : > { %v1611_v61 = vpop.f32.mrb[20].mxu0 }
 0x9d1   : > { %v1703_v49 = vrot.slane %v1611_v61, 2  ;;  %v2103_v35 = vpop.f32.mrb[21].mxu0 }
 0x9d2   : > { %v1614_v1 = vpop.f32.mrb[22].mxu0 }
 0x9d3   : > { %v2104_v3 = vpop.f32.mrb[23].mxu0  ;;  %v1704_v58 = vsel %vm830_vm10, %v1703_v49, %v1702_v7 }
 0x9d4   : > { %v1679_v16 = vpop.f32.mrb[16].mxu1 }
 0x9d5   : > { %v1705_v11 = vrot.slane %v1679_v16, 1  ;;  %v2109_v13 = vpop.f32.mrb[17].mxu1 }
 0x9d6   : > { %v1682_v39 = vpop.f32.mrb[18].mxu1 }
 0x9d7   : > { %v2110_v45 = vpop.f32.mrb[19].mxu1  ;;  %v1706_v52 = vsel %vm832_vm11, %v1705_v11, %v1704_v58  ;;  %v1800_v39 = vld [vmem:[%s1799_s2] sm:$0xff] }
 0x9d8   : > { %1707 = vrot.lane.b32.xlu0 %v1706_v52, %s2527_s13 }
 0xa2a   : > { %v1830_v43 = vpop.permute.xlu1 %1829 }
 0xa4a   : > { %v1708_v12 = vpop.permute.xlu0 %1707 }
 0xa4b   : > { %v1710_v6 = vadd.f32 %v1708_v12, %v3613_v41 }
 0xa4d   : > { %v1719_v48 = vadd.f32 %v1717_v4, %v1710_v6 }
 0xa4f   : > { %2242 = vtanh.f32 %v1719_v48 }
 0xa59   : > { %v2243_v37 = vpop.eup %2242 }
 0xa5a   : > { %v1721_v8 = vpack.c.bf16 %v2243_v37, %v2243_v37 }
 0xa5c   : > { %1729 = vrot.lane.b32.xlu0 %v1721_v8, %s2530_s1 }
 0xace   : > { %v1730_v53 = vpop.permute.xlu0 %1729 }
 0xacf   : > { %2116 = vmatmul.mubr.msk.bf16.vlgmr.msra.gmra.mrb[24].mxu0 %vm254_vm1, %v1730_v53 }
 0xba2   : > { %v1780_v50 = vpop.f32.mrb[24].mxu0 }
 0xba3   : > { %v1781_v9 = vadd.f32 %v3614_v36, %v1780_v50  ;;  %v2117_v54 = vpop.f32.mrb[25].mxu0 }
 0xba4   : > { %v1783_v38 = vpop.f32.mrb[26].mxu0 }
 0xba5   : > { %v1832_v63 = vadd.f32 %v1830_v43, %v1781_v9  ;;  %v2118_v5 = vpop.f32.mrb[27].mxu0  ;;  %v1786_v47 = vsel %vm322_vm3, %v1781_v9, -inf }
 0xba7   : > { %v1834_v0 = vsel %vm1833_vm13, %v1832_v63, -inf }
 0xba8   : > { %1835 = vmax.xlane.f32.xlu0 %v1834_v0 }
 0xc35   : > { %v1836_v42 = vpop.xlane.xlu0 %1835 }
 0xc36   : > { %v1837_v2 = vsub.f32 %v1832_v63, %v1836_v42  ;;  %v3616_v42 = vld [vmem:[#allocation44_spill] sm:$0xff] }
 0xc38   : > { %v1838_v60 = vmul.f32 1.442695, %v1837_v2 }
 0xc3a   : > { %2244 = vpow2.f32 %v1838_v60 }
 0xc44   : > { %v2245_v59 = vpop.eup %2244 }
 0xc45   : > { %1841 = vrot.lane.b32.xlu1 %v2245_v59, %s2528_s15 }
 0xc69   : > { %1787 = vmax.xlane.f32.xlu1 %v1786_v47 }
 0xc7a   : > { %1853 = vrot.lane.b32.xlu1 %v3615_v34, %s2528_s15 }
 0xcb7   : > { %v1842_v10 = vpop.permute.xlu1 %1841 }
 0xcb8   : > { %v1844_v40 = vsel %vm835_vm12, %v1842_v10, 0.0 }
 0xcb9   : > { %1845 = vadd.xlane.f32.xlu0 %v1844_v40 }
 0xcf6   : > { %v1788_v15 = vpop.xlane.xlu1 %1787 }
 0xcf7   : > { %v1789_v7 = vsub.f32 %v1781_v9, %v1788_v15 }
 0xcf9   : > { %v1790_v51 = vmul.f32 1.442695, %v1789_v7 }
 0xcfa   : > { %v1854_v17 = vpop.permute.xlu1 %1853 }
 0xcfb   : > { %2246 = vpow2.f32 %v1790_v51 }
 0xd05   : > { %v2247_v61 = vpop.eup %2246 }
 0xd06   : > { %v1792_v49 = vsel %vm322_vm3, %v2247_v61, 0.0 }
 0xd07   : > { %1793 = vadd.xlane.f32.xlu0 %v1792_v49 }
 0xd46   : > { %v1846_v35 = vpop.xlane.xlu0 %1845 }
 0xd47   : > { %2248 = vrcp.f32 %v1846_v35 }
 0xd51   : > { %v2249_v1 = vpop.eup %2248 }
 0xd52   : > { %v1848_v3 = vmul.f32 %v2249_v1, %v2245_v59 }
 0xd54   : > { %v1849_v58 = vsel %vm1833_vm13, %v1848_v3, -inf }
 0xd55   : > { %1850 = vmax.xlane.f32.xlu0 %v1849_v58 }
 0xd94   : > { %v1794_v16 = vpop.xlane.xlu0 %1793 }
 0xd95   : > { %2250 = vlog2.f32 %v1794_v16 }
 0xd9f   : > { %v2251_v11 = vpop.eup %2250 }
 0xda0   : > { %v1796_v13 = vmul.f32 0.6931472, %v2251_v11  ;;  %v3618_v11 = vld [vmem:[#allocation45_spill] sm:$0xff] }
 0xda2   : > { %v1797_v45 = vsub.f32 %v1789_v7, %v1796_v13  ;;  %v2004_v13 = vadd.s32 4294967295, %v3618_v11 }
 0xda4   : > { %v1801_v52 = vmul.f32 %v1800_v39, %v1797_v45 }
 0xda6   : > { %1890 = vst.msk [vmem:[%s1889_s28] sm:$0xff] %vm322_vm3, %v1801_v52  ;;  %v1802_v41 = vsel %vm322_vm3, %v1801_v52, -inf }
 0xde2   : > { %v1851_v62 = vpop.xlane.xlu0 %1850 }
 0xde3   : > { %vm1852_vm14 = vcmp.eq.f32.partialorder %v1848_v3, %v1851_v62 }
 0xde4   : > { %v1855_v46 = vsel %vm1852_vm14, %v1854_v17, 16 }
 0xde5   : > { %v1856_v44 = vsel %vm1833_vm13, %v1855_v46, 2147483647 }
 0xde6   : > { %v1858_v12 = vshra.s32 %v1856_v44, 16  ;;  %v1857_v6 = vand.u32 65535, %v1856_v44 }
 0xde8   : > { %v1860_v4 = vcvt.s32.f32 %v1858_v12  ;;  %v1859_v14 = vcvt.s32.f32 %v1857_v6 }
 0xdea   : > { %1861 = vmin.xlane.f32.xlu0 %v1860_v4 }
 0xdee   : > { %1803 = vmax.xlane.f32.xlu0 %v1802_v41 }
 0xe77   : > { %v1862_v48 = vpop.xlane.xlu0 %1861 }
 0xe78   : > { %vm1863_vm15 = vcmp.eq.f32.partialorder %v1860_v4, %v1862_v48  ;;  %v1868_v9 = vcvt.f32.s32 %v1862_v48 }
 0xe79   : > { %v1864_v37 = vsel %vm1863_vm15, %v1859_v14, inf }
 0xe7a   : > { %1865 = vmin.xlane.f32.xlu0 %v1864_v37  ;;  %v1869_v38 = vshll.u32 %v1868_v9, 16 }
 0xe7b   : > { %v1804_v8 = vpop.xlane.xlu0 %1803 }
 0xe7c   : > { %vm1805_vm0 = vcmp.eq.f32.partialorder %v1801_v52, %v1804_v8 }
 0xe7d   : > { %v1806_v53 = vsel %vm1805_vm0, %v3615_v34, 64 }
 0xe7e   : > { %v1807_v50 = vsel %vm322_vm3, %v1806_v53, 2147483647  ;;  %vm1898_vm3 = vcmask 7168  }
 0xe7f   : > { %v1809_v43 = vshra.s32 %v1807_v50, 16  ;;  %v1808_v0 = vand.u32 65535, %v1807_v50 }
 0xe81   : > { %v1811_v36 = vcvt.s32.f32 %v1809_v43  ;;  %v1810_v10 = vcvt.s32.f32 %v1808_v0 }
 0xe83   : > { %1812 = vmin.xlane.f32.xlu0 %v1811_v36 }
 0xf07   : > { %v1866_v54 = vpop.xlane.xlu0 %1865 }
 0xf08   : > { %v1867_v63 = vcvt.f32.s32 %v1866_v54 }
 0xf0a   : > { %v1870_v5 = vadd.s32 %v1869_v38, %v1867_v63 }
 0xf0c   : > { %vm1871_vm1 = vcmp.eq.s32.totalorder %v3615_v34, %v1870_v5  ;;  %v3617_v34 = vld [vmem:[#allocation67_spill] sm:$0xff]  ;;  %vm1887_vm4 = vcmp.lt.s32.totalorder %v1870_v5, %v2004_v13 }
 0xf0d   : > { %v1872_v2 = vsel %vm1871_vm1, %v3616_v42, 0 }
 0xf0e   : > { %v1873_v60 = vsel %vm835_vm12, %v1872_v2, 0 }
 0xf0f   : > { %v1875_v59 = vshrl.u32 %v1873_v60, 16  ;;  %v1874_v7 = vand.u32 65535, %v1873_v60 }
 0xf10   : > { %v1813_v47 = vpop.xlane.xlu0 %1812 }
 0xf11   : > { %v1877_v40 = vcvt.s32.f32 %v1875_v59  ;;  %vm1814_vm2 = vcmp.eq.f32.partialorder %v1811_v36, %v1813_v47  ;;  %v1876_v51 = vcvt.s32.f32 %v1874_v7  ;;  %v1819_v1 = vcvt.f32.s32 %v1813_v47 }
 0xf12   : > { %v1815_v15 = vsel %vm1814_vm2, %v1810_v10, inf }
 0xf13   : > { %1880 = vadd.xlane.f32.xlu1 %v1877_v40  ;;  %1816 = vmin.xlane.f32.xlu0 %v1815_v15 }
 0xf29   : > { %1892 = vrot.lane.b32.xlu0 %v1848_v3, %s2528_s15  ;;  %v1820_v3 = vshll.u32 %v1819_v1, 16 }
 0xf48   : > { %1878 = vadd.xlane.f32.xlu0 %v1876_v51 }
 0xf5e   : > { %1901 = vrot.lane.b32.xlu0 %v3617_v34, %s2527_s13 }
 0xfa0   : > { %v1817_v61 = vpop.xlane.xlu0 %1816  ;;  %v1881_v35 = vpop.xlane.xlu1 %1880 }
 0xfa1   : > { %v1883_v58 = vcvt.f32.s32 %v1881_v35  ;;  %v1818_v16 = vcvt.f32.s32 %v1817_v61 }
 0xfa3   : > { %v1884_v45 = vshll.u32 %v1883_v58, 16  ;;  %v1821_v17 = vadd.s32 %v1820_v3, %v1818_v16 }
 0xfa4   : > { %v1893_v49 = vpop.permute.xlu0 %1892 }
 0xfa5   : > { %1896 = vst.msk [vmem:[%s1895_s29] sm:$0xff] %vm835_vm12, %v1893_v49 }
 0xfd5   : > { %v1879_v39 = vpop.xlane.xlu0 %1878  ;;  %230 = sbr.rel (!%p228_p8) target bundleno = 198 (0xc6), region = 144 }
 0xfd6   : > { %v1882_v52 = vcvt.f32.s32 %v1879_v39 }
 0xfd8   : > { %v1885_v62 = vadd.s32 %v1884_v45, %v1882_v52 }
 0xfd9   : > { %v1902_v61 = vpop.permute.xlu0 %1901  }
 0xfda   : > { %v1888_v62 = vsel %vm1887_vm4, %v1885_v62, %v1821_v17  }
 0xfdb   : > { %1899 = vst.msk [vmem:[%s1897_s22] sm:$0xff] %vm1898_vm3, %v1888_v62 }
 0xfdc   :  { %2439 = shalt.err (!%p2436_p13)
}
 0xfdd   :  { %s2440_s23 = scalar_lea.hbm %s3487_s16, 1920 }
 0xfde   :  { %p2441_p0 = scmp.ne.s32.totalorder %s3487_s16, %s2440_s23  ;;  %p2444_p1 = scmp.lt.u32.totalorder %s2440_s23, %s3487_s16 }
 0xfe0   :  { %p2446_p2 = pnand %p2444_p1, %p2441_p0 }
 0xfe2   :  { %2449 = shalt.err (!%p2446_p2)
}
 0xfe3   :  { %1915 = dma.vmem_to_hbm [thread:$0]  %s1910_s27, 1920, %s3487_s16, [#allocation4], %s2518_s7, %s2518_s7, %s2519_s19  }
 0xfe4   :  { %s2450_s11 = scalar_lea.vmem %s3434_s8, 1920  ;;  %p2455_p4 = scmp.lt.s32.totalorder %s3434_s8, %s3434_s8 }
 0xfe5   :  { %p2451_p3 = scmp.ne.s32.totalorder %s3434_s8, %s2450_s11  ;;  %p2456_p5 = scmp.lt.s32.totalorder %s2450_s11, %s2450_s11 }
 0xfe7   :  { %p2457_p6 = por %p2456_p5, %p2455_p4 }
 0xfe9   :  { %p2458_p7 = pnand %p2457_p6, %p2451_p3 }
 0xfeb   :  { %2461 = shalt.err (!%p2458_p7)
}
 0xfec   :  { %s3619_s13 = sld [smem:[#allocation72_spill]] }
 0xff2   :  { %s2462_s15 = scalar_lea.hbm %s3619_s13, 1920 }
 0xff3   :  { %p2463_p8 = scmp.ne.s32.totalorder %s3619_s13, %s2462_s15  ;;  %p2466_p9 = scmp.lt.u32.totalorder %s2462_s15, %s3619_s13 }
 0xff5   :  { %p2468_p10 = pnand %p2466_p9, %p2463_p8 }
 0xff7   :  { %2471 = shalt.err (!%p2468_p10)
}
 0xff8   :  { %1927 = dma.vmem_to_hbm [thread:$0]  %s3434_s8, 1920, %s3619_s13, [#allocation18], %s2518_s7, %s2518_s7, %s2519_s19  }
 0xff9   :  { %2494 = dma.done.wait [#allocation4], 1920  }
 0xffa   :  { %2495 = vsyncadd [#allocation4], 4294965376 }
 0xffb   :  { %2496 = dma.done.wait [#allocation18], 1920  }
 0xffc   :  { %2497 = vsyncadd [#allocation18], 4294965376 }
 0xffd   :  { %1938 = vsyncpa [#allocation3], 1 }
 0xffe   :  { %1939 = vsyncpa [#allocation6], 1 }
 0xfff   :  { %1940 = vsyncpa [#allocation9], 1 }
0x1000   :  { %1941 = vsyncpa [#allocation12], 1 }
0x1001   :  { %1942 = vsyncpa [#allocation15], 1 }
0x1002   :  { %1943 = vsyncpa [#allocation4], 1 }
0x1003   :  { %1944 = vsyncpa [#allocation18], 1 }

</bundles_post_ra>
